<compile_context>
chip_gen: v5e
topology: v5e:2x2
jax: 0.10.0
libtpu: 0.0.40
codegen_flags: <defaults>
</compile_context>

<pallas_src>
import math
import jax
import jax.numpy as jnp
from jax.experimental import pallas as pl
from jax.experimental.pallas import tpu as pltpu  # noqa: F401  (kept for TPU backend import)

# ---- small config consistent with the module (scaled down) ----
B, S, D = 2, 8, 32          # batch, sequence length, d_model ("size")
D_FF = 64                   # feed-forward hidden dim
H = 4                       # attention heads (D % H == 0)
K = 7                       # conv kernel size
C = 4                       # number of conv sublayers
EPS = 1e-6                  # LayerNorm eps (added to std, as in the module)
PAD = K // 2
D_K = D // H


# ------------------------- fused Pallas kernel (no grid) -------------------------

def encoder_layer_kernel(x_ref, bias_ref, convw_ref, convb_ref, lng_ref, lnb_ref,
                         wqkv_ref, bqkv_ref, wo_ref, bo_ref,
                         w1_ref, b1_ref, w2_ref, b2_ref, out_ref):
    # x: (B*S, D)  bias: (B*S, B*S) additive attention bias (block-diag + key mask)
    # convw: (K*D, D)  lng/lnb: (C+2, D)  wqkv: (D, 3D) with q cols pre-scaled
    x = x_ref[...].astype(jnp.float32)                    # (16, 32)

    lng = lng_ref[...]
    lnb = lnb_ref[...]
    conv_w = convw_ref[...]                               # (K*D, D)
    conv_b = convb_ref[...]                               # (1, D)
    bias = bias_ref[...]                                  # (16, 16)
    wo = wo_ref[...]                                      # (D, D)
    zeros_pad = jnp.zeros((PAD, D), jnp.float32)          # halo rows (hoisted)

    def layernorm(z, g, b):
        # Matches PyTorch LayerNorm: unbiased std (N-1), eps added to std.
        mean = jnp.mean(z, axis=-1, keepdims=True)
        zc = z - mean
        var = jnp.sum(zc * zc, axis=-1, keepdims=True) * (1.0 / (D - 1))
        inv_std = pl.reciprocal(jnp.sqrt(var) + EPS, approx=True)   # EUP, (rows,1)
        return g * (zc * inv_std) + b

    # ---- C conv SublayerConnections: x = x + relu(Conv1d(LN(x))) ----
    for i in range(C):
        xn = layernorm(x, lng[i:i + 1, :], lnb[i:i + 1, :])         # (16, 32)
        cols = []
        for b in range(B):                                          # per-batch halo
            xp = jnp.concatenate(
                [zeros_pad, xn[b * S:(b + 1) * S, :], zeros_pad], axis=0)   # (S+2p, D)
            cols.append(jnp.concatenate([xp[k:k + S, :] for k in range(K)], axis=-1))
        xcol = jnp.concatenate(cols, axis=0)                        # (B*S, K*D) = (16, 224)
        y = jnp.dot(xcol, conv_w, preferred_element_type=jnp.float32) + conv_b
        x = x + jnp.maximum(y, 0.0)                                 # residual (dropout = id)

    # ---- self-attention SublayerConnection: x = x + Wo(MHA(LN(x))) ----
    xn = layernorm(x, lng[C:C + 1, :], lnb[C:C + 1, :])
    qkv = jnp.dot(xn, wqkv_ref[...], preferred_element_type=jnp.float32) + bqkv_ref[...]
    attn_out = jnp.zeros((B * S, D), jnp.float32)
    for h in range(H):                                              # static d_k=8 slices
        q_h = qkv[:, h * D_K:(h + 1) * D_K]
        k_h = qkv[:, D + h * D_K: D + (h + 1) * D_K]
        v_h = qkv[:, 2 * D + h * D_K: 2 * D + (h + 1) * D_K]
        # scores over the stacked (B*S) rows; cross-batch / masked keys killed by bias
        s = jnp.dot(q_h, k_h.T, preferred_element_type=jnp.float32) + bias
        s = s - jnp.max(s, axis=-1, keepdims=True)
        p = jnp.exp(s)
        p = p * pl.reciprocal(jnp.sum(p, axis=-1, keepdims=True), approx=True)
        ctx_h = jnp.dot(p, v_h, preferred_element_type=jnp.float32)            # (16, d_k)
        # project through this head's Wo rows and accumulate (no lane concat)
        attn_out = attn_out + jnp.dot(ctx_h, wo[h * D_K:(h + 1) * D_K, :],
                                      preferred_element_type=jnp.float32)
    x = x + attn_out + bo_ref[...]

    # ---- FFN SublayerConnection: x = x + W2(relu(W1 LN(x))) ----
    xn = layernorm(x, lng[C + 1:C + 2, :], lnb[C + 1:C + 2, :])
    h1 = jnp.maximum(jnp.dot(xn, w1_ref[...], preferred_element_type=jnp.float32)
                     + b1_ref[...], 0.0)
    x = x + jnp.dot(h1, w2_ref[...], preferred_element_type=jnp.float32) + b2_ref[...]

    out_ref[...] = x.astype(out_ref.dtype)


# ------------------------- pallas_call wrapper -------------------------

def encoder_layer(x, mask, p):
    scale = 1.0 / math.sqrt(D_K)
    x_flat = x.reshape(B * S, D)

    # Additive attention bias: block-diagonal over batches + key mask (precomputed).
    row_batch = jnp.arange(B * S) // S
    batch_eq = row_batch[:, None] == row_batch[None, :]
    key_ok = mask[:, 0, :].reshape(B * S) != 0.0
    attn_bias = jnp.where(batch_eq & key_ok[None, :], 0.0, -1e9).astype(jnp.float32)

    # Fold the 1/sqrt(d_k) scale into the q columns of the fused QKV projection.
    wqkv_s = jnp.concatenate([p['wqkv'][:, :D] * scale, p['wqkv'][:, D:]], axis=1)
    bqkv_s = jnp.concatenate([p['bqkv'][:, :D] * scale, p['bqkv'][:, D:]], axis=1)

    conv_w_col = p['conv_w'].reshape(K * D, D)            # (K, D_in, D_out) -> im2col form

    out_flat = pl.pallas_call(
        encoder_layer_kernel,
        out_shape=jax.ShapeDtypeStruct((B * S, D), x.dtype),
    )(x_flat, attn_bias, conv_w_col, p['conv_b'], p['ln_g'], p['ln_b'],
      wqkv_s, bqkv_s, p['wo'], p['bo'], p['w1'], p['b1'], p['w2'], p['b2'])
    return out_flat.reshape(B, S, D)


# ------------------------- deterministic parameters -------------------------

def init_params(key):
    ks = jax.random.split(key, 10)

    def lin(k, fan_in, fan_out):
        lim = 1.0 / math.sqrt(fan_in)
        kw, kb = jax.random.split(k)
        w = jax.random.uniform(kw, (fan_in, fan_out), jnp.float32, -lim, lim)
        b = jax.random.uniform(kb, (1, fan_out), jnp.float32, -lim, lim)
        return w, b

    p = {}
    # Conv1d(size, size, K): torch weight (D_out, D_in, K) -> stored as (K, D_in, D_out)
    lim = 1.0 / math.sqrt(D * K)
    conv_w_torch = jax.random.uniform(ks[0], (D, D, K), jnp.float32, -lim, lim)
    p['conv_w'] = jnp.transpose(conv_w_torch, (2, 1, 0))
    p['conv_b'] = jax.random.uniform(ks[1], (1, D), jnp.float32, -lim, lim)
    wq, bq = lin(ks[2], D, D)
    wk, bk = lin(ks[3], D, D)
    wv, bv = lin(ks[4], D, D)
    p['wqkv'] = jnp.concatenate([wq, wk, wv], axis=1)     # fused q/k/v projection
    p['bqkv'] = jnp.concatenate([bq, bk, bv], axis=1)
    p['wo'], p['bo'] = lin(ks[5], D, D)
    p['w1'], p['b1'] = lin(ks[6], D, D_FF)
    p['w2'], p['b2'] = lin(ks[7], D_FF, D)
    # LayerNorm params for the C+2 SublayerConnections (perturbed from ones/zeros)
    p['ln_g'] = 1.0 + 0.05 * jax.random.normal(ks[8], (C + 2, D), jnp.float32)
    p['ln_b'] = 0.05 * jax.random.normal(ks[9], (C + 2, D), jnp.float32)
    return p


# ------------------------- pure-JAX reference -------------------------

def reference(x, mask, p):
    def ln(z, g, b):
        mean = jnp.mean(z, -1, keepdims=True)
        std = jnp.sqrt(jnp.sum((z - mean) ** 2, -1, keepdims=True) / (z.shape[-1] - 1))
        return g * (z - mean) / (std + EPS) + b

    # C conv SublayerConnections: x + relu(conv1d(LN(x)))
    for i in range(C):
        xn = ln(x, p['ln_g'][i], p['ln_b'][i])
        xpad = jnp.pad(xn, ((0, 0), (K // 2, K // 2), (0, 0)))
        y = jnp.zeros_like(x)
        for k in range(K):
            y = y + jnp.einsum('bsi,io->bso', xpad[:, k:k + S], p['conv_w'][k])
        x = x + jnp.maximum(y + p['conv_b'], 0.0)

    # attention SublayerConnection: x + Wo(MHA(LN(x)))
    xn = ln(x, p['ln_g'][C], p['ln_b'][C])
    d_k = D // H
    wq, wk, wv = p['wqkv'][:, :D], p['wqkv'][:, D:2 * D], p['wqkv'][:, 2 * D:]
    bq, bk, bv = p['bqkv'][:, :D], p['bqkv'][:, D:2 * D], p['bqkv'][:, 2 * D:]
    q = (xn @ wq + bq).reshape(B, S, H, d_k).transpose(0, 2, 1, 3)
    kk = (xn @ wk + bk).reshape(B, S, H, d_k).transpose(0, 2, 1, 3)
    v = (xn @ wv + bv).reshape(B, S, H, d_k).transpose(0, 2, 1, 3)
    scores = jnp.einsum('bhqd,bhkd->bhqk', q, kk) / math.sqrt(d_k)
    scores = jnp.where(mask[:, None] == 0.0, -1e9, scores)
    pa = jax.nn.softmax(scores, axis=-1)
    ctx = jnp.einsum('bhqk,bhkd->bhqd', pa, v).transpose(0, 2, 1, 3).reshape(B, S, D)
    x = x + ctx @ p['wo'] + p['bo']

    # FFN SublayerConnection: x + W2(relu(W1 LN(x)))
    xn = ln(x, p['ln_g'][C + 1], p['ln_b'][C + 1])
    h1 = jnp.maximum(xn @ p['w1'] + p['b1'], 0.0)
    return x + h1 @ p['w2'] + p['b2']


# ------------------------- main -------------------------

if __name__ == "__main__":
    key = jax.random.PRNGKey(0)
    kx, kp = jax.random.split(key)
    x = jax.random.normal(kx, (B, S, D), jnp.float32)
    # mask: 1 = attend, 0 = masked; mask out last 2 key positions of batch 1
    mask = jnp.ones((B, 1, S), jnp.float32)
    mask = mask.at[1, 0, S - 2:].set(0.0)

    params = init_params(kp)
    out = jax.jit(encoder_layer)(x, mask, params)
    out = jax.block_until_ready(out)

    ref = reference(x, mask, params)
    assert out.shape == (B, S, D)
    # Relaxed tolerance: both the softmax denominator and the LayerNorm inverse use the
    # EUP approximate reciprocal (pl.reciprocal(approx=True)) per the perf feedback.
    err = float(jnp.max(jnp.abs(out - ref)))
    assert jnp.allclose(out, ref, rtol=2e-2, atol=2e-2), err
    print("KERNEL_OK")
</pallas_src>

<mosaic_0001>
module attributes {stable_mosaic.version = 11 : i64} {
  func.func @encoder_layer_kernel(%arg0: memref<16x32xf32, #tpu.memory_space<vmem>>, %arg1: memref<16x16xf32, #tpu.memory_space<vmem>>, %arg2: memref<224x32xf32, #tpu.memory_space<vmem>>, %arg3: memref<1x32xf32, #tpu.memory_space<vmem>>, %arg4: memref<6x32xf32, #tpu.memory_space<vmem>>, %arg5: memref<6x32xf32, #tpu.memory_space<vmem>>, %arg6: memref<32x96xf32, #tpu.memory_space<vmem>>, %arg7: memref<1x96xf32, #tpu.memory_space<vmem>>, %arg8: memref<32x32xf32, #tpu.memory_space<vmem>>, %arg9: memref<1x32xf32, #tpu.memory_space<vmem>>, %arg10: memref<32x64xf32, #tpu.memory_space<vmem>>, %arg11: memref<1x64xf32, #tpu.memory_space<vmem>>, %arg12: memref<64x32xf32, #tpu.memory_space<vmem>>, %arg13: memref<1x32xf32, #tpu.memory_space<vmem>>, %arg14: memref<16x32xf32, #tpu.memory_space<vmem>>) attributes {dimension_semantics = [], scalar_prefetch = 0 : i64, scratch_operands = 0 : i64, tpu.core_type = #tpu.core_type<tc>} {
    %c0 = arith.constant 0 : index
    %c0_0 = arith.constant 0 : index
    %0 = vector.load %arg0[%c0, %c0_0] : memref<16x32xf32, #tpu.memory_space<vmem>>, vector<16x32xf32>
    %c0_1 = arith.constant 0 : index
    %c0_2 = arith.constant 0 : index
    %1 = vector.load %arg4[%c0_1, %c0_2] : memref<6x32xf32, #tpu.memory_space<vmem>>, vector<6x32xf32>
    %c0_3 = arith.constant 0 : index
    %c0_4 = arith.constant 0 : index
    %2 = vector.load %arg5[%c0_3, %c0_4] : memref<6x32xf32, #tpu.memory_space<vmem>>, vector<6x32xf32>
    %c0_5 = arith.constant 0 : index
    %c0_6 = arith.constant 0 : index
    %3 = vector.load %arg2[%c0_5, %c0_6] : memref<224x32xf32, #tpu.memory_space<vmem>>, vector<224x32xf32>
    %c0_7 = arith.constant 0 : index
    %c0_8 = arith.constant 0 : index
    %4 = vector.load %arg3[%c0_7, %c0_8] : memref<1x32xf32, #tpu.memory_space<vmem>>, vector<1x32xf32>
    %c0_9 = arith.constant 0 : index
    %c0_10 = arith.constant 0 : index
    %5 = vector.load %arg1[%c0_9, %c0_10] : memref<16x16xf32, #tpu.memory_space<vmem>>, vector<16x16xf32>
    %c0_11 = arith.constant 0 : index
    %c0_12 = arith.constant 0 : index
    %6 = vector.load %arg8[%c0_11, %c0_12] : memref<32x32xf32, #tpu.memory_space<vmem>>, vector<32x32xf32>
    %cst = arith.constant 0.000000e+00 : f32
    %7 = vector.broadcast %cst : f32 to vector<3x32xf32>
    %8 = vector.extract_strided_slice %1 {offsets = [0, 0], sizes = [1, 32], strides = [1, 1]} : vector<6x32xf32> to vector<1x32xf32>
    %9 = vector.extract_strided_slice %2 {offsets = [0, 0], sizes = [1, 32], strides = [1, 1]} : vector<6x32xf32> to vector<1x32xf32>
    %cst_13 = arith.constant dense<0.000000e+00> : vector<16xf32>
    %10 = vector.multi_reduction <add>, %0, %cst_13 [1] : vector<16x32xf32> to vector<16xf32>
    %11 = vector.shape_cast %10 : vector<16xf32> to vector<16x1xf32>
    %cst_14 = arith.constant 3.200000e+01 : f32
    %12 = vector.broadcast %cst_14 : f32 to vector<16x1xf32>
    %13 = arith.divf %11, %12 : vector<16x1xf32>
    %14 = vector.broadcast %13 : vector<16x1xf32> to vector<16x32xf32>
    %15 = arith.subf %0, %14 : vector<16x32xf32>
    %16 = arith.mulf %15, %15 : vector<16x32xf32>
    %cst_15 = arith.constant dense<0.000000e+00> : vector<16xf32>
    %17 = vector.multi_reduction <add>, %16, %cst_15 [1] : vector<16x32xf32> to vector<16xf32>
    %18 = vector.shape_cast %17 : vector<16xf32> to vector<16x1xf32>
    %cst_16 = arith.constant 0.0322580636 : f32
    %19 = vector.broadcast %cst_16 : f32 to vector<16x1xf32>
    %20 = arith.mulf %18, %19 : vector<16x1xf32>
    %21 = math.sqrt %20 : vector<16x1xf32>
    %cst_17 = arith.constant 9.99999997E-7 : f32
    %22 = vector.broadcast %cst_17 : f32 to vector<16x1xf32>
    %23 = arith.addf %21, %22 : vector<16x1xf32>
    %24 = tpu.reciprocal %23 {approx = true} : vector<16x1xf32> -> vector<16x1xf32>
    %25 = vector.broadcast %24 : vector<16x1xf32> to vector<16x32xf32>
    %26 = arith.mulf %15, %25 : vector<16x32xf32>
    %27 = vector.broadcast %8 : vector<1x32xf32> to vector<16x32xf32>
    %28 = arith.mulf %27, %26 : vector<16x32xf32>
    %29 = vector.broadcast %9 : vector<1x32xf32> to vector<16x32xf32>
    %30 = arith.addf %28, %29 : vector<16x32xf32>
    %31 = vector.extract_strided_slice %30 {offsets = [0, 0], sizes = [8, 32], strides = [1, 1]} : vector<16x32xf32> to vector<8x32xf32>
    %32 = tpu.concatenate %7, %31, %7 in 0 : vector<3x32xf32>, vector<8x32xf32>, vector<3x32xf32> -> vector<14x32xf32>
    %33 = vector.extract_strided_slice %32 {offsets = [0, 0], sizes = [8, 32], strides = [1, 1]} : vector<14x32xf32> to vector<8x32xf32>
    %34 = vector.extract_strided_slice %32 {offsets = [1, 0], sizes = [8, 32], strides = [1, 1]} : vector<14x32xf32> to vector<8x32xf32>
    %35 = vector.extract_strided_slice %32 {offsets = [2, 0], sizes = [8, 32], strides = [1, 1]} : vector<14x32xf32> to vector<8x32xf32>
    %36 = vector.extract_strided_slice %32 {offsets = [3, 0], sizes = [8, 32], strides = [1, 1]} : vector<14x32xf32> to vector<8x32xf32>
    %37 = vector.extract_strided_slice %32 {offsets = [4, 0], sizes = [8, 32], strides = [1, 1]} : vector<14x32xf32> to vector<8x32xf32>
    %38 = vector.extract_strided_slice %32 {offsets = [5, 0], sizes = [8, 32], strides = [1, 1]} : vector<14x32xf32> to vector<8x32xf32>
    %39 = vector.extract_strided_slice %32 {offsets = [6, 0], sizes = [8, 32], strides = [1, 1]} : vector<14x32xf32> to vector<8x32xf32>
    %40 = tpu.concatenate %33, %34, %35, %36, %37, %38, %39 in 1 : vector<8x32xf32>, vector<8x32xf32>, vector<8x32xf32>, vector<8x32xf32>, vector<8x32xf32>, vector<8x32xf32>, vector<8x32xf32> -> vector<8x224xf32>
    %41 = vector.extract_strided_slice %30 {offsets = [8, 0], sizes = [8, 32], strides = [1, 1]} : vector<16x32xf32> to vector<8x32xf32>
    %42 = tpu.concatenate %7, %41, %7 in 0 : vector<3x32xf32>, vector<8x32xf32>, vector<3x32xf32> -> vector<14x32xf32>
    %43 = vector.extract_strided_slice %42 {offsets = [0, 0], sizes = [8, 32], strides = [1, 1]} : vector<14x32xf32> to vector<8x32xf32>
    %44 = vector.extract_strided_slice %42 {offsets = [1, 0], sizes = [8, 32], strides = [1, 1]} : vector<14x32xf32> to vector<8x32xf32>
    %45 = vector.extract_strided_slice %42 {offsets = [2, 0], sizes = [8, 32], strides = [1, 1]} : vector<14x32xf32> to vector<8x32xf32>
    %46 = vector.extract_strided_slice %42 {offsets = [3, 0], sizes = [8, 32], strides = [1, 1]} : vector<14x32xf32> to vector<8x32xf32>
    %47 = vector.extract_strided_slice %42 {offsets = [4, 0], sizes = [8, 32], strides = [1, 1]} : vector<14x32xf32> to vector<8x32xf32>
    %48 = vector.extract_strided_slice %42 {offsets = [5, 0], sizes = [8, 32], strides = [1, 1]} : vector<14x32xf32> to vector<8x32xf32>
    %49 = vector.extract_strided_slice %42 {offsets = [6, 0], sizes = [8, 32], strides = [1, 1]} : vector<14x32xf32> to vector<8x32xf32>
    %50 = tpu.concatenate %43, %44, %45, %46, %47, %48, %49 in 1 : vector<8x32xf32>, vector<8x32xf32>, vector<8x32xf32>, vector<8x32xf32>, vector<8x32xf32>, vector<8x32xf32>, vector<8x32xf32> -> vector<8x224xf32>
    %51 = tpu.concatenate %40, %50 in 0 : vector<8x224xf32>, vector<8x224xf32> -> vector<16x224xf32>
    %cst_18 = arith.constant dense<0.000000e+00> : vector<16x32xf32>
    %52 = tpu.matmul %51, %3, %cst_18 {dimension_numbers = #tpu.dot_dimension_numbers<[1], [0], [0], [1], [0, 0, 1, 1], [], []>} : vector<16x224xf32>, vector<224x32xf32>, vector<16x32xf32> -> vector<16x32xf32>
    %53 = vector.broadcast %4 : vector<1x32xf32> to vector<16x32xf32>
    %54 = arith.addf %52, %53 : vector<16x32xf32>
    %cst_19 = arith.constant 0.000000e+00 : f32
    %55 = vector.broadcast %cst_19 : f32 to vector<16x32xf32>
    %56 = arith.maximumf %54, %55 : vector<16x32xf32>
    %57 = arith.addf %0, %56 : vector<16x32xf32>
    %58 = vector.extract_strided_slice %1 {offsets = [1, 0], sizes = [1, 32], strides = [1, 1]} : vector<6x32xf32> to vector<1x32xf32>
    %59 = vector.extract_strided_slice %2 {offsets = [1, 0], sizes = [1, 32], strides = [1, 1]} : vector<6x32xf32> to vector<1x32xf32>
    %cst_20 = arith.constant dense<0.000000e+00> : vector<16xf32>
    %60 = vector.multi_reduction <add>, %57, %cst_20 [1] : vector<16x32xf32> to vector<16xf32>
    %61 = vector.shape_cast %60 : vector<16xf32> to vector<16x1xf32>
    %cst_21 = arith.constant 3.200000e+01 : f32
    %62 = vector.broadcast %cst_21 : f32 to vector<16x1xf32>
    %63 = arith.divf %61, %62 : vector<16x1xf32>
    %64 = vector.broadcast %63 : vector<16x1xf32> to vector<16x32xf32>
    %65 = arith.subf %57, %64 : vector<16x32xf32>
    %66 = arith.mulf %65, %65 : vector<16x32xf32>
    %cst_22 = arith.constant dense<0.000000e+00> : vector<16xf32>
    %67 = vector.multi_reduction <add>, %66, %cst_22 [1] : vector<16x32xf32> to vector<16xf32>
    %68 = vector.shape_cast %67 : vector<16xf32> to vector<16x1xf32>
    %cst_23 = arith.constant 0.0322580636 : f32
    %69 = vector.broadcast %cst_23 : f32 to vector<16x1xf32>
    %70 = arith.mulf %68, %69 : vector<16x1xf32>
    %71 = math.sqrt %70 : vector<16x1xf32>
    %cst_24 = arith.constant 9.99999997E-7 : f32
    %72 = vector.broadcast %cst_24 : f32 to vector<16x1xf32>
    %73 = arith.addf %71, %72 : vector<16x1xf32>
    %74 = tpu.reciprocal %73 {approx = true} : vector<16x1xf32> -> vector<16x1xf32>
    %75 = vector.broadcast %74 : vector<16x1xf32> to vector<16x32xf32>
    %76 = arith.mulf %65, %75 : vector<16x32xf32>
    %77 = vector.broadcast %58 : vector<1x32xf32> to vector<16x32xf32>
    %78 = arith.mulf %77, %76 : vector<16x32xf32>
    %79 = vector.broadcast %59 : vector<1x32xf32> to vector<16x32xf32>
    %80 = arith.addf %78, %79 : vector<16x32xf32>
    %81 = vector.extract_strided_slice %80 {offsets = [0, 0], sizes = [8, 32], strides = [1, 1]} : vector<16x32xf32> to vector<8x32xf32>
    %82 = tpu.concatenate %7, %81, %7 in 0 : vector<3x32xf32>, vector<8x32xf32>, vector<3x32xf32> -> vector<14x32xf32>
    %83 = vector.extract_strided_slice %82 {offsets = [0, 0], sizes = [8, 32], strides = [1, 1]} : vector<14x32xf32> to vector<8x32xf32>
    %84 = vector.extract_strided_slice %82 {offsets = [1, 0], sizes = [8, 32], strides = [1, 1]} : vector<14x32xf32> to vector<8x32xf32>
    %85 = vector.extract_strided_slice %82 {offsets = [2, 0], sizes = [8, 32], strides = [1, 1]} : vector<14x32xf32> to vector<8x32xf32>
    %86 = vector.extract_strided_slice %82 {offsets = [3, 0], sizes = [8, 32], strides = [1, 1]} : vector<14x32xf32> to vector<8x32xf32>
    %87 = vector.extract_strided_slice %82 {offsets = [4, 0], sizes = [8, 32], strides = [1, 1]} : vector<14x32xf32> to vector<8x32xf32>
    %88 = vector.extract_strided_slice %82 {offsets = [5, 0], sizes = [8, 32], strides = [1, 1]} : vector<14x32xf32> to vector<8x32xf32>
    %89 = vector.extract_strided_slice %82 {offsets = [6, 0], sizes = [8, 32], strides = [1, 1]} : vector<14x32xf32> to vector<8x32xf32>
    %90 = tpu.concatenate %83, %84, %85, %86, %87, %88, %89 in 1 : vector<8x32xf32>, vector<8x32xf32>, vector<8x32xf32>, vector<8x32xf32>, vector<8x32xf32>, vector<8x32xf32>, vector<8x32xf32> -> vector<8x224xf32>
    %91 = vector.extract_strided_slice %80 {offsets = [8, 0], sizes = [8, 32], strides = [1, 1]} : vector<16x32xf32> to vector<8x32xf32>
    %92 = tpu.concatenate %7, %91, %7 in 0 : vector<3x32xf32>, vector<8x32xf32>, vector<3x32xf32> -> vector<14x32xf32>
    %93 = vector.extract_strided_slice %92 {offsets = [0, 0], sizes = [8, 32], strides = [1, 1]} : vector<14x32xf32> to vector<8x32xf32>
    %94 = vector.extract_strided_slice %92 {offsets = [1, 0], sizes = [8, 32], strides = [1, 1]} : vector<14x32xf32> to vector<8x32xf32>
    %95 = vector.extract_strided_slice %92 {offsets = [2, 0], sizes = [8, 32], strides = [1, 1]} : vector<14x32xf32> to vector<8x32xf32>
    %96 = vector.extract_strided_slice %92 {offsets = [3, 0], sizes = [8, 32], strides = [1, 1]} : vector<14x32xf32> to vector<8x32xf32>
    %97 = vector.extract_strided_slice %92 {offsets = [4, 0], sizes = [8, 32], strides = [1, 1]} : vector<14x32xf32> to vector<8x32xf32>
    %98 = vector.extract_strided_slice %92 {offsets = [5, 0], sizes = [8, 32], strides = [1, 1]} : vector<14x32xf32> to vector<8x32xf32>
    %99 = vector.extract_strided_slice %92 {offsets = [6, 0], sizes = [8, 32], strides = [1, 1]} : vector<14x32xf32> to vector<8x32xf32>
    %100 = tpu.concatenate %93, %94, %95, %96, %97, %98, %99 in 1 : vector<8x32xf32>, vector<8x32xf32>, vector<8x32xf32>, vector<8x32xf32>, vector<8x32xf32>, vector<8x32xf32>, vector<8x32xf32> -> vector<8x224xf32>
    %101 = tpu.concatenate %90, %100 in 0 : vector<8x224xf32>, vector<8x224xf32> -> vector<16x224xf32>
    %cst_25 = arith.constant dense<0.000000e+00> : vector<16x32xf32>
    %102 = tpu.matmul %101, %3, %cst_25 {dimension_numbers = #tpu.dot_dimension_numbers<[1], [0], [0], [1], [0, 0, 1, 1], [], []>} : vector<16x224xf32>, vector<224x32xf32>, vector<16x32xf32> -> vector<16x32xf32>
    %103 = vector.broadcast %4 : vector<1x32xf32> to vector<16x32xf32>
    %104 = arith.addf %102, %103 : vector<16x32xf32>
    %cst_26 = arith.constant 0.000000e+00 : f32
    %105 = vector.broadcast %cst_26 : f32 to vector<16x32xf32>
    %106 = arith.maximumf %104, %105 : vector<16x32xf32>
    %107 = arith.addf %57, %106 : vector<16x32xf32>
    %108 = vector.extract_strided_slice %1 {offsets = [2, 0], sizes = [1, 32], strides = [1, 1]} : vector<6x32xf32> to vector<1x32xf32>
    %109 = vector.extract_strided_slice %2 {offsets = [2, 0], sizes = [1, 32], strides = [1, 1]} : vector<6x32xf32> to vector<1x32xf32>
    %cst_27 = arith.constant dense<0.000000e+00> : vector<16xf32>
    %110 = vector.multi_reduction <add>, %107, %cst_27 [1] : vector<16x32xf32> to vector<16xf32>
    %111 = vector.shape_cast %110 : vector<16xf32> to vector<16x1xf32>
    %cst_28 = arith.constant 3.200000e+01 : f32
    %112 = vector.broadcast %cst_28 : f32 to vector<16x1xf32>
    %113 = arith.divf %111, %112 : vector<16x1xf32>
    %114 = vector.broadcast %113 : vector<16x1xf32> to vector<16x32xf32>
    %115 = arith.subf %107, %114 : vector<16x32xf32>
    %116 = arith.mulf %115, %115 : vector<16x32xf32>
    %cst_29 = arith.constant dense<0.000000e+00> : vector<16xf32>
    %117 = vector.multi_reduction <add>, %116, %cst_29 [1] : vector<16x32xf32> to vector<16xf32>
    %118 = vector.shape_cast %117 : vector<16xf32> to vector<16x1xf32>
    %cst_30 = arith.constant 0.0322580636 : f32
    %119 = vector.broadcast %cst_30 : f32 to vector<16x1xf32>
    %120 = arith.mulf %118, %119 : vector<16x1xf32>
    %121 = math.sqrt %120 : vector<16x1xf32>
    %cst_31 = arith.constant 9.99999997E-7 : f32
    %122 = vector.broadcast %cst_31 : f32 to vector<16x1xf32>
    %123 = arith.addf %121, %122 : vector<16x1xf32>
    %124 = tpu.reciprocal %123 {approx = true} : vector<16x1xf32> -> vector<16x1xf32>
    %125 = vector.broadcast %124 : vector<16x1xf32> to vector<16x32xf32>
    %126 = arith.mulf %115, %125 : vector<16x32xf32>
    %127 = vector.broadcast %108 : vector<1x32xf32> to vector<16x32xf32>
    %128 = arith.mulf %127, %126 : vector<16x32xf32>
    %129 = vector.broadcast %109 : vector<1x32xf32> to vector<16x32xf32>
    %130 = arith.addf %128, %129 : vector<16x32xf32>
    %131 = vector.extract_strided_slice %130 {offsets = [0, 0], sizes = [8, 32], strides = [1, 1]} : vector<16x32xf32> to vector<8x32xf32>
    %132 = tpu.concatenate %7, %131, %7 in 0 : vector<3x32xf32>, vector<8x32xf32>, vector<3x32xf32> -> vector<14x32xf32>
    %133 = vector.extract_strided_slice %132 {offsets = [0, 0], sizes = [8, 32], strides = [1, 1]} : vector<14x32xf32> to vector<8x32xf32>
    %134 = vector.extract_strided_slice %132 {offsets = [1, 0], sizes = [8, 32], strides = [1, 1]} : vector<14x32xf32> to vector<8x32xf32>
    %135 = vector.extract_strided_slice %132 {offsets = [2, 0], sizes = [8, 32], strides = [1, 1]} : vector<14x32xf32> to vector<8x32xf32>
    %136 = vector.extract_strided_slice %132 {offsets = [3, 0], sizes = [8, 32], strides = [1, 1]} : vector<14x32xf32> to vector<8x32xf32>
    %137 = vector.extract_strided_slice %132 {offsets = [4, 0], sizes = [8, 32], strides = [1, 1]} : vector<14x32xf32> to vector<8x32xf32>
    %138 = vector.extract_strided_slice %132 {offsets = [5, 0], sizes = [8, 32], strides = [1, 1]} : vector<14x32xf32> to vector<8x32xf32>
    %139 = vector.extract_strided_slice %132 {offsets = [6, 0], sizes = [8, 32], strides = [1, 1]} : vector<14x32xf32> to vector<8x32xf32>
    %140 = tpu.concatenate %133, %134, %135, %136, %137, %138, %139 in 1 : vector<8x32xf32>, vector<8x32xf32>, vector<8x32xf32>, vector<8x32xf32>, vector<8x32xf32>, vector<8x32xf32>, vector<8x32xf32> -> vector<8x224xf32>
    %141 = vector.extract_strided_slice %130 {offsets = [8, 0], sizes = [8, 32], strides = [1, 1]} : vector<16x32xf32> to vector<8x32xf32>
    %142 = tpu.concatenate %7, %141, %7 in 0 : vector<3x32xf32>, vector<8x32xf32>, vector<3x32xf32> -> vector<14x32xf32>
    %143 = vector.extract_strided_slice %142 {offsets = [0, 0], sizes = [8, 32], strides = [1, 1]} : vector<14x32xf32> to vector<8x32xf32>
    %144 = vector.extract_strided_slice %142 {offsets = [1, 0], sizes = [8, 32], strides = [1, 1]} : vector<14x32xf32> to vector<8x32xf32>
    %145 = vector.extract_strided_slice %142 {offsets = [2, 0], sizes = [8, 32], strides = [1, 1]} : vector<14x32xf32> to vector<8x32xf32>
    %146 = vector.extract_strided_slice %142 {offsets = [3, 0], sizes = [8, 32], strides = [1, 1]} : vector<14x32xf32> to vector<8x32xf32>
    %147 = vector.extract_strided_slice %142 {offsets = [4, 0], sizes = [8, 32], strides = [1, 1]} : vector<14x32xf32> to vector<8x32xf32>
    %148 = vector.extract_strided_slice %142 {offsets = [5, 0], sizes = [8, 32], strides = [1, 1]} : vector<14x32xf32> to vector<8x32xf32>
    %149 = vector.extract_strided_slice %142 {offsets = [6, 0], sizes = [8, 32], strides = [1, 1]} : vector<14x32xf32> to vector<8x32xf32>
    %150 = tpu.concatenate %143, %144, %145, %146, %147, %148, %149 in 1 : vector<8x32xf32>, vector<8x32xf32>, vector<8x32xf32>, vector<8x32xf32>, vector<8x32xf32>, vector<8x32xf32>, vector<8x32xf32> -> vector<8x224xf32>
    %151 = tpu.concatenate %140, %150 in 0 : vector<8x224xf32>, vector<8x224xf32> -> vector<16x224xf32>
    %cst_32 = arith.constant dense<0.000000e+00> : vector<16x32xf32>
    %152 = tpu.matmul %151, %3, %cst_32 {dimension_numbers = #tpu.dot_dimension_numbers<[1], [0], [0], [1], [0, 0, 1, 1], [], []>} : vector<16x224xf32>, vector<224x32xf32>, vector<16x32xf32> -> vector<16x32xf32>
    %153 = vector.broadcast %4 : vector<1x32xf32> to vector<16x32xf32>
    %154 = arith.addf %152, %153 : vector<16x32xf32>
    %cst_33 = arith.constant 0.000000e+00 : f32
    %155 = vector.broadcast %cst_33 : f32 to vector<16x32xf32>
    %156 = arith.maximumf %154, %155 : vector<16x32xf32>
    %157 = arith.addf %107, %156 : vector<16x32xf32>
    %158 = vector.extract_strided_slice %1 {offsets = [3, 0], sizes = [1, 32], strides = [1, 1]} : vector<6x32xf32> to vector<1x32xf32>
    %159 = vector.extract_strided_slice %2 {offsets = [3, 0], sizes = [1, 32], strides = [1, 1]} : vector<6x32xf32> to vector<1x32xf32>
    %cst_34 = arith.constant dense<0.000000e+00> : vector<16xf32>
    %160 = vector.multi_reduction <add>, %157, %cst_34 [1] : vector<16x32xf32> to vector<16xf32>
    %161 = vector.shape_cast %160 : vector<16xf32> to vector<16x1xf32>
    %cst_35 = arith.constant 3.200000e+01 : f32
    %162 = vector.broadcast %cst_35 : f32 to vector<16x1xf32>
    %163 = arith.divf %161, %162 : vector<16x1xf32>
    %164 = vector.broadcast %163 : vector<16x1xf32> to vector<16x32xf32>
    %165 = arith.subf %157, %164 : vector<16x32xf32>
    %166 = arith.mulf %165, %165 : vector<16x32xf32>
    %cst_36 = arith.constant dense<0.000000e+00> : vector<16xf32>
    %167 = vector.multi_reduction <add>, %166, %cst_36 [1] : vector<16x32xf32> to vector<16xf32>
    %168 = vector.shape_cast %167 : vector<16xf32> to vector<16x1xf32>
    %cst_37 = arith.constant 0.0322580636 : f32
    %169 = vector.broadcast %cst_37 : f32 to vector<16x1xf32>
    %170 = arith.mulf %168, %169 : vector<16x1xf32>
    %171 = math.sqrt %170 : vector<16x1xf32>
    %cst_38 = arith.constant 9.99999997E-7 : f32
    %172 = vector.broadcast %cst_38 : f32 to vector<16x1xf32>
    %173 = arith.addf %171, %172 : vector<16x1xf32>
    %174 = tpu.reciprocal %173 {approx = true} : vector<16x1xf32> -> vector<16x1xf32>
    %175 = vector.broadcast %174 : vector<16x1xf32> to vector<16x32xf32>
    %176 = arith.mulf %165, %175 : vector<16x32xf32>
    %177 = vector.broadcast %158 : vector<1x32xf32> to vector<16x32xf32>
    %178 = arith.mulf %177, %176 : vector<16x32xf32>
    %179 = vector.broadcast %159 : vector<1x32xf32> to vector<16x32xf32>
    %180 = arith.addf %178, %179 : vector<16x32xf32>
    %181 = vector.extract_strided_slice %180 {offsets = [0, 0], sizes = [8, 32], strides = [1, 1]} : vector<16x32xf32> to vector<8x32xf32>
    %182 = tpu.concatenate %7, %181, %7 in 0 : vector<3x32xf32>, vector<8x32xf32>, vector<3x32xf32> -> vector<14x32xf32>
    %183 = vector.extract_strided_slice %182 {offsets = [0, 0], sizes = [8, 32], strides = [1, 1]} : vector<14x32xf32> to vector<8x32xf32>
    %184 = vector.extract_strided_slice %182 {offsets = [1, 0], sizes = [8, 32], strides = [1, 1]} : vector<14x32xf32> to vector<8x32xf32>
    %185 = vector.extract_strided_slice %182 {offsets = [2, 0], sizes = [8, 32], strides = [1, 1]} : vector<14x32xf32> to vector<8x32xf32>
    %186 = vector.extract_strided_slice %182 {offsets = [3, 0], sizes = [8, 32], strides = [1, 1]} : vector<14x32xf32> to vector<8x32xf32>
    %187 = vector.extract_strided_slice %182 {offsets = [4, 0], sizes = [8, 32], strides = [1, 1]} : vector<14x32xf32> to vector<8x32xf32>
    %188 = vector.extract_strided_slice %182 {offsets = [5, 0], sizes = [8, 32], strides = [1, 1]} : vector<14x32xf32> to vector<8x32xf32>
    %189 = vector.extract_strided_slice %182 {offsets = [6, 0], sizes = [8, 32], strides = [1, 1]} : vector<14x32xf32> to vector<8x32xf32>
    %190 = tpu.concatenate %183, %184, %185, %186, %187, %188, %189 in 1 : vector<8x32xf32>, vector<8x32xf32>, vector<8x32xf32>, vector<8x32xf32>, vector<8x32xf32>, vector<8x32xf32>, vector<8x32xf32> -> vector<8x224xf32>
    %191 = vector.extract_strided_slice %180 {offsets = [8, 0], sizes = [8, 32], strides = [1, 1]} : vector<16x32xf32> to vector<8x32xf32>
    %192 = tpu.concatenate %7, %191, %7 in 0 : vector<3x32xf32>, vector<8x32xf32>, vector<3x32xf32> -> vector<14x32xf32>
    %193 = vector.extract_strided_slice %192 {offsets = [0, 0], sizes = [8, 32], strides = [1, 1]} : vector<14x32xf32> to vector<8x32xf32>
    %194 = vector.extract_strided_slice %192 {offsets = [1, 0], sizes = [8, 32], strides = [1, 1]} : vector<14x32xf32> to vector<8x32xf32>
    %195 = vector.extract_strided_slice %192 {offsets = [2, 0], sizes = [8, 32], strides = [1, 1]} : vector<14x32xf32> to vector<8x32xf32>
    %196 = vector.extract_strided_slice %192 {offsets = [3, 0], sizes = [8, 32], strides = [1, 1]} : vector<14x32xf32> to vector<8x32xf32>
    %197 = vector.extract_strided_slice %192 {offsets = [4, 0], sizes = [8, 32], strides = [1, 1]} : vector<14x32xf32> to vector<8x32xf32>
    %198 = vector.extract_strided_slice %192 {offsets = [5, 0], sizes = [8, 32], strides = [1, 1]} : vector<14x32xf32> to vector<8x32xf32>
    %199 = vector.extract_strided_slice %192 {offsets = [6, 0], sizes = [8, 32], strides = [1, 1]} : vector<14x32xf32> to vector<8x32xf32>
    %200 = tpu.concatenate %193, %194, %195, %196, %197, %198, %199 in 1 : vector<8x32xf32>, vector<8x32xf32>, vector<8x32xf32>, vector<8x32xf32>, vector<8x32xf32>, vector<8x32xf32>, vector<8x32xf32> -> vector<8x224xf32>
    %201 = tpu.concatenate %190, %200 in 0 : vector<8x224xf32>, vector<8x224xf32> -> vector<16x224xf32>
    %cst_39 = arith.constant dense<0.000000e+00> : vector<16x32xf32>
    %202 = tpu.matmul %201, %3, %cst_39 {dimension_numbers = #tpu.dot_dimension_numbers<[1], [0], [0], [1], [0, 0, 1, 1], [], []>} : vector<16x224xf32>, vector<224x32xf32>, vector<16x32xf32> -> vector<16x32xf32>
    %203 = vector.broadcast %4 : vector<1x32xf32> to vector<16x32xf32>
    %204 = arith.addf %202, %203 : vector<16x32xf32>
    %cst_40 = arith.constant 0.000000e+00 : f32
    %205 = vector.broadcast %cst_40 : f32 to vector<16x32xf32>
    %206 = arith.maximumf %204, %205 : vector<16x32xf32>
    %207 = arith.addf %157, %206 : vector<16x32xf32>
    %208 = vector.extract_strided_slice %1 {offsets = [4, 0], sizes = [1, 32], strides = [1, 1]} : vector<6x32xf32> to vector<1x32xf32>
    %209 = vector.extract_strided_slice %2 {offsets = [4, 0], sizes = [1, 32], strides = [1, 1]} : vector<6x32xf32> to vector<1x32xf32>
    %cst_41 = arith.constant dense<0.000000e+00> : vector<16xf32>
    %210 = vector.multi_reduction <add>, %207, %cst_41 [1] : vector<16x32xf32> to vector<16xf32>
    %211 = vector.shape_cast %210 : vector<16xf32> to vector<16x1xf32>
    %cst_42 = arith.constant 3.200000e+01 : f32
    %212 = vector.broadcast %cst_42 : f32 to vector<16x1xf32>
    %213 = arith.divf %211, %212 : vector<16x1xf32>
    %214 = vector.broadcast %213 : vector<16x1xf32> to vector<16x32xf32>
    %215 = arith.subf %207, %214 : vector<16x32xf32>
    %216 = arith.mulf %215, %215 : vector<16x32xf32>
    %cst_43 = arith.constant dense<0.000000e+00> : vector<16xf32>
    %217 = vector.multi_reduction <add>, %216, %cst_43 [1] : vector<16x32xf32> to vector<16xf32>
    %218 = vector.shape_cast %217 : vector<16xf32> to vector<16x1xf32>
    %cst_44 = arith.constant 0.0322580636 : f32
    %219 = vector.broadcast %cst_44 : f32 to vector<16x1xf32>
    %220 = arith.mulf %218, %219 : vector<16x1xf32>
    %221 = math.sqrt %220 : vector<16x1xf32>
    %cst_45 = arith.constant 9.99999997E-7 : f32
    %222 = vector.broadcast %cst_45 : f32 to vector<16x1xf32>
    %223 = arith.addf %221, %222 : vector<16x1xf32>
    %224 = tpu.reciprocal %223 {approx = true} : vector<16x1xf32> -> vector<16x1xf32>
    %225 = vector.broadcast %224 : vector<16x1xf32> to vector<16x32xf32>
    %226 = arith.mulf %215, %225 : vector<16x32xf32>
    %227 = vector.broadcast %208 : vector<1x32xf32> to vector<16x32xf32>
    %228 = arith.mulf %227, %226 : vector<16x32xf32>
    %229 = vector.broadcast %209 : vector<1x32xf32> to vector<16x32xf32>
    %230 = arith.addf %228, %229 : vector<16x32xf32>
    %c0_46 = arith.constant 0 : index
    %c0_47 = arith.constant 0 : index
    %231 = vector.load %arg6[%c0_46, %c0_47] : memref<32x96xf32, #tpu.memory_space<vmem>>, vector<32x96xf32>
    %cst_48 = arith.constant dense<0.000000e+00> : vector<16x96xf32>
    %232 = tpu.matmul %230, %231, %cst_48 {dimension_numbers = #tpu.dot_dimension_numbers<[1], [0], [0], [1], [0, 0, 1, 1], [], []>} : vector<16x32xf32>, vector<32x96xf32>, vector<16x96xf32> -> vector<16x96xf32>
    %c0_49 = arith.constant 0 : index
    %c0_50 = arith.constant 0 : index
    %233 = vector.load %arg7[%c0_49, %c0_50] : memref<1x96xf32, #tpu.memory_space<vmem>>, vector<1x96xf32>
    %234 = vector.broadcast %233 : vector<1x96xf32> to vector<16x96xf32>
    %235 = arith.addf %232, %234 : vector<16x96xf32>
    %cst_51 = arith.constant 0.000000e+00 : f32
    %236 = vector.broadcast %cst_51 : f32 to vector<16x32xf32>
    %237 = vector.extract_strided_slice %235 {offsets = [0, 0], sizes = [16, 8], strides = [1, 1]} : vector<16x96xf32> to vector<16x8xf32>
    %238 = vector.extract_strided_slice %235 {offsets = [0, 32], sizes = [16, 8], strides = [1, 1]} : vector<16x96xf32> to vector<16x8xf32>
    %239 = vector.extract_strided_slice %235 {offsets = [0, 64], sizes = [16, 8], strides = [1, 1]} : vector<16x96xf32> to vector<16x8xf32>
    %240 = tpu.transpose %238, [1, 0] : vector<16x8xf32> -> vector<8x16xf32>
    %cst_52 = arith.constant dense<0.000000e+00> : vector<16x16xf32>
    %241 = tpu.matmul %237, %240, %cst_52 {dimension_numbers = #tpu.dot_dimension_numbers<[1], [0], [0], [1], [0, 0, 1, 1], [], []>} : vector<16x8xf32>, vector<8x16xf32>, vector<16x16xf32> -> vector<16x16xf32>
    %242 = arith.addf %241, %5 : vector<16x16xf32>
    %cst_53 = arith.constant dense<0xFF800000> : vector<16xf32>
    %243 = vector.multi_reduction <maximumf>, %242, %cst_53 [1] : vector<16x16xf32> to vector<16xf32>
    %244 = vector.shape_cast %243 : vector<16xf32> to vector<16x1xf32>
    %245 = vector.broadcast %244 : vector<16x1xf32> to vector<16x16xf32>
    %246 = arith.subf %242, %245 : vector<16x16xf32>
    %247 = math.exp %246 : vector<16x16xf32>
    %cst_54 = arith.constant dense<0.000000e+00> : vector<16xf32>
    %248 = vector.multi_reduction <add>, %247, %cst_54 [1] : vector<16x16xf32> to vector<16xf32>
    %249 = vector.shape_cast %248 : vector<16xf32> to vector<16x1xf32>
    %250 = tpu.reciprocal %249 {approx = true} : vector<16x1xf32> -> vector<16x1xf32>
    %251 = vector.broadcast %250 : vector<16x1xf32> to vector<16x16xf32>
    %252 = arith.mulf %247, %251 : vector<16x16xf32>
    %cst_55 = arith.constant dense<0.000000e+00> : vector<16x8xf32>
    %253 = tpu.matmul %252, %239, %cst_55 {dimension_numbers = #tpu.dot_dimension_numbers<[1], [0], [0], [1], [0, 0, 1, 1], [], []>} : vector<16x16xf32>, vector<16x8xf32>, vector<16x8xf32> -> vector<16x8xf32>
    %254 = vector.extract_strided_slice %6 {offsets = [0, 0], sizes = [8, 32], strides = [1, 1]} : vector<32x32xf32> to vector<8x32xf32>
    %cst_56 = arith.constant dense<0.000000e+00> : vector<16x32xf32>
    %255 = tpu.matmul %253, %254, %cst_56 {dimension_numbers = #tpu.dot_dimension_numbers<[1], [0], [0], [1], [0, 0, 1, 1], [], []>} : vector<16x8xf32>, vector<8x32xf32>, vector<16x32xf32> -> vector<16x32xf32>
    %256 = arith.addf %236, %255 : vector<16x32xf32>
    %257 = vector.extract_strided_slice %235 {offsets = [0, 8], sizes = [16, 8], strides = [1, 1]} : vector<16x96xf32> to vector<16x8xf32>
    %258 = vector.extract_strided_slice %235 {offsets = [0, 40], sizes = [16, 8], strides = [1, 1]} : vector<16x96xf32> to vector<16x8xf32>
    %259 = vector.extract_strided_slice %235 {offsets = [0, 72], sizes = [16, 8], strides = [1, 1]} : vector<16x96xf32> to vector<16x8xf32>
    %260 = tpu.transpose %258, [1, 0] : vector<16x8xf32> -> vector<8x16xf32>
    %cst_57 = arith.constant dense<0.000000e+00> : vector<16x16xf32>
    %261 = tpu.matmul %257, %260, %cst_57 {dimension_numbers = #tpu.dot_dimension_numbers<[1], [0], [0], [1], [0, 0, 1, 1], [], []>} : vector<16x8xf32>, vector<8x16xf32>, vector<16x16xf32> -> vector<16x16xf32>
    %262 = arith.addf %261, %5 : vector<16x16xf32>
    %cst_58 = arith.constant dense<0xFF800000> : vector<16xf32>
    %263 = vector.multi_reduction <maximumf>, %262, %cst_58 [1] : vector<16x16xf32> to vector<16xf32>
    %264 = vector.shape_cast %263 : vector<16xf32> to vector<16x1xf32>
    %265 = vector.broadcast %264 : vector<16x1xf32> to vector<16x16xf32>
    %266 = arith.subf %262, %265 : vector<16x16xf32>
    %267 = math.exp %266 : vector<16x16xf32>
    %cst_59 = arith.constant dense<0.000000e+00> : vector<16xf32>
    %268 = vector.multi_reduction <add>, %267, %cst_59 [1] : vector<16x16xf32> to vector<16xf32>
    %269 = vector.shape_cast %268 : vector<16xf32> to vector<16x1xf32>
    %270 = tpu.reciprocal %269 {approx = true} : vector<16x1xf32> -> vector<16x1xf32>
    %271 = vector.broadcast %270 : vector<16x1xf32> to vector<16x16xf32>
    %272 = arith.mulf %267, %271 : vector<16x16xf32>
    %cst_60 = arith.constant dense<0.000000e+00> : vector<16x8xf32>
    %273 = tpu.matmul %272, %259, %cst_60 {dimension_numbers = #tpu.dot_dimension_numbers<[1], [0], [0], [1], [0, 0, 1, 1], [], []>} : vector<16x16xf32>, vector<16x8xf32>, vector<16x8xf32> -> vector<16x8xf32>
    %274 = vector.extract_strided_slice %6 {offsets = [8, 0], sizes = [8, 32], strides = [1, 1]} : vector<32x32xf32> to vector<8x32xf32>
    %cst_61 = arith.constant dense<0.000000e+00> : vector<16x32xf32>
    %275 = tpu.matmul %273, %274, %cst_61 {dimension_numbers = #tpu.dot_dimension_numbers<[1], [0], [0], [1], [0, 0, 1, 1], [], []>} : vector<16x8xf32>, vector<8x32xf32>, vector<16x32xf32> -> vector<16x32xf32>
    %276 = arith.addf %256, %275 : vector<16x32xf32>
    %277 = vector.extract_strided_slice %235 {offsets = [0, 16], sizes = [16, 8], strides = [1, 1]} : vector<16x96xf32> to vector<16x8xf32>
    %278 = vector.extract_strided_slice %235 {offsets = [0, 48], sizes = [16, 8], strides = [1, 1]} : vector<16x96xf32> to vector<16x8xf32>
    %279 = vector.extract_strided_slice %235 {offsets = [0, 80], sizes = [16, 8], strides = [1, 1]} : vector<16x96xf32> to vector<16x8xf32>
    %280 = tpu.transpose %278, [1, 0] : vector<16x8xf32> -> vector<8x16xf32>
    %cst_62 = arith.constant dense<0.000000e+00> : vector<16x16xf32>
    %281 = tpu.matmul %277, %280, %cst_62 {dimension_numbers = #tpu.dot_dimension_numbers<[1], [0], [0], [1], [0, 0, 1, 1], [], []>} : vector<16x8xf32>, vector<8x16xf32>, vector<16x16xf32> -> vector<16x16xf32>
    %282 = arith.addf %281, %5 : vector<16x16xf32>
    %cst_63 = arith.constant dense<0xFF800000> : vector<16xf32>
    %283 = vector.multi_reduction <maximumf>, %282, %cst_63 [1] : vector<16x16xf32> to vector<16xf32>
    %284 = vector.shape_cast %283 : vector<16xf32> to vector<16x1xf32>
    %285 = vector.broadcast %284 : vector<16x1xf32> to vector<16x16xf32>
    %286 = arith.subf %282, %285 : vector<16x16xf32>
    %287 = math.exp %286 : vector<16x16xf32>
    %cst_64 = arith.constant dense<0.000000e+00> : vector<16xf32>
    %288 = vector.multi_reduction <add>, %287, %cst_64 [1] : vector<16x16xf32> to vector<16xf32>
    %289 = vector.shape_cast %288 : vector<16xf32> to vector<16x1xf32>
    %290 = tpu.reciprocal %289 {approx = true} : vector<16x1xf32> -> vector<16x1xf32>
    %291 = vector.broadcast %290 : vector<16x1xf32> to vector<16x16xf32>
    %292 = arith.mulf %287, %291 : vector<16x16xf32>
    %cst_65 = arith.constant dense<0.000000e+00> : vector<16x8xf32>
    %293 = tpu.matmul %292, %279, %cst_65 {dimension_numbers = #tpu.dot_dimension_numbers<[1], [0], [0], [1], [0, 0, 1, 1], [], []>} : vector<16x16xf32>, vector<16x8xf32>, vector<16x8xf32> -> vector<16x8xf32>
    %294 = vector.extract_strided_slice %6 {offsets = [16, 0], sizes = [8, 32], strides = [1, 1]} : vector<32x32xf32> to vector<8x32xf32>
    %cst_66 = arith.constant dense<0.000000e+00> : vector<16x32xf32>
    %295 = tpu.matmul %293, %294, %cst_66 {dimension_numbers = #tpu.dot_dimension_numbers<[1], [0], [0], [1], [0, 0, 1, 1], [], []>} : vector<16x8xf32>, vector<8x32xf32>, vector<16x32xf32> -> vector<16x32xf32>
    %296 = arith.addf %276, %295 : vector<16x32xf32>
    %297 = vector.extract_strided_slice %235 {offsets = [0, 24], sizes = [16, 8], strides = [1, 1]} : vector<16x96xf32> to vector<16x8xf32>
    %298 = vector.extract_strided_slice %235 {offsets = [0, 56], sizes = [16, 8], strides = [1, 1]} : vector<16x96xf32> to vector<16x8xf32>
    %299 = vector.extract_strided_slice %235 {offsets = [0, 88], sizes = [16, 8], strides = [1, 1]} : vector<16x96xf32> to vector<16x8xf32>
    %300 = tpu.transpose %298, [1, 0] : vector<16x8xf32> -> vector<8x16xf32>
    %cst_67 = arith.constant dense<0.000000e+00> : vector<16x16xf32>
    %301 = tpu.matmul %297, %300, %cst_67 {dimension_numbers = #tpu.dot_dimension_numbers<[1], [0], [0], [1], [0, 0, 1, 1], [], []>} : vector<16x8xf32>, vector<8x16xf32>, vector<16x16xf32> -> vector<16x16xf32>
    %302 = arith.addf %301, %5 : vector<16x16xf32>
    %cst_68 = arith.constant dense<0xFF800000> : vector<16xf32>
    %303 = vector.multi_reduction <maximumf>, %302, %cst_68 [1] : vector<16x16xf32> to vector<16xf32>
    %304 = vector.shape_cast %303 : vector<16xf32> to vector<16x1xf32>
    %305 = vector.broadcast %304 : vector<16x1xf32> to vector<16x16xf32>
    %306 = arith.subf %302, %305 : vector<16x16xf32>
    %307 = math.exp %306 : vector<16x16xf32>
    %cst_69 = arith.constant dense<0.000000e+00> : vector<16xf32>
    %308 = vector.multi_reduction <add>, %307, %cst_69 [1] : vector<16x16xf32> to vector<16xf32>
    %309 = vector.shape_cast %308 : vector<16xf32> to vector<16x1xf32>
    %310 = tpu.reciprocal %309 {approx = true} : vector<16x1xf32> -> vector<16x1xf32>
    %311 = vector.broadcast %310 : vector<16x1xf32> to vector<16x16xf32>
    %312 = arith.mulf %307, %311 : vector<16x16xf32>
    %cst_70 = arith.constant dense<0.000000e+00> : vector<16x8xf32>
    %313 = tpu.matmul %312, %299, %cst_70 {dimension_numbers = #tpu.dot_dimension_numbers<[1], [0], [0], [1], [0, 0, 1, 1], [], []>} : vector<16x16xf32>, vector<16x8xf32>, vector<16x8xf32> -> vector<16x8xf32>
    %314 = vector.extract_strided_slice %6 {offsets = [24, 0], sizes = [8, 32], strides = [1, 1]} : vector<32x32xf32> to vector<8x32xf32>
    %cst_71 = arith.constant dense<0.000000e+00> : vector<16x32xf32>
    %315 = tpu.matmul %313, %314, %cst_71 {dimension_numbers = #tpu.dot_dimension_numbers<[1], [0], [0], [1], [0, 0, 1, 1], [], []>} : vector<16x8xf32>, vector<8x32xf32>, vector<16x32xf32> -> vector<16x32xf32>
    %316 = arith.addf %296, %315 : vector<16x32xf32>
    %317 = arith.addf %207, %316 : vector<16x32xf32>
    %c0_72 = arith.constant 0 : index
    %c0_73 = arith.constant 0 : index
    %318 = vector.load %arg9[%c0_72, %c0_73] : memref<1x32xf32, #tpu.memory_space<vmem>>, vector<1x32xf32>
    %319 = vector.broadcast %318 : vector<1x32xf32> to vector<16x32xf32>
    %320 = arith.addf %317, %319 : vector<16x32xf32>
    %321 = vector.extract_strided_slice %1 {offsets = [5, 0], sizes = [1, 32], strides = [1, 1]} : vector<6x32xf32> to vector<1x32xf32>
    %322 = vector.extract_strided_slice %2 {offsets = [5, 0], sizes = [1, 32], strides = [1, 1]} : vector<6x32xf32> to vector<1x32xf32>
    %cst_74 = arith.constant dense<0.000000e+00> : vector<16xf32>
    %323 = vector.multi_reduction <add>, %320, %cst_74 [1] : vector<16x32xf32> to vector<16xf32>
    %324 = vector.shape_cast %323 : vector<16xf32> to vector<16x1xf32>
    %cst_75 = arith.constant 3.200000e+01 : f32
    %325 = vector.broadcast %cst_75 : f32 to vector<16x1xf32>
    %326 = arith.divf %324, %325 : vector<16x1xf32>
    %327 = vector.broadcast %326 : vector<16x1xf32> to vector<16x32xf32>
    %328 = arith.subf %320, %327 : vector<16x32xf32>
    %329 = arith.mulf %328, %328 : vector<16x32xf32>
    %cst_76 = arith.constant dense<0.000000e+00> : vector<16xf32>
    %330 = vector.multi_reduction <add>, %329, %cst_76 [1] : vector<16x32xf32> to vector<16xf32>
    %331 = vector.shape_cast %330 : vector<16xf32> to vector<16x1xf32>
    %cst_77 = arith.constant 0.0322580636 : f32
    %332 = vector.broadcast %cst_77 : f32 to vector<16x1xf32>
    %333 = arith.mulf %331, %332 : vector<16x1xf32>
    %334 = math.sqrt %333 : vector<16x1xf32>
    %cst_78 = arith.constant 9.99999997E-7 : f32
    %335 = vector.broadcast %cst_78 : f32 to vector<16x1xf32>
    %336 = arith.addf %334, %335 : vector<16x1xf32>
    %337 = tpu.reciprocal %336 {approx = true} : vector<16x1xf32> -> vector<16x1xf32>
    %338 = vector.broadcast %337 : vector<16x1xf32> to vector<16x32xf32>
    %339 = arith.mulf %328, %338 : vector<16x32xf32>
    %340 = vector.broadcast %321 : vector<1x32xf32> to vector<16x32xf32>
    %341 = arith.mulf %340, %339 : vector<16x32xf32>
    %342 = vector.broadcast %322 : vector<1x32xf32> to vector<16x32xf32>
    %343 = arith.addf %341, %342 : vector<16x32xf32>
    %c0_79 = arith.constant 0 : index
    %c0_80 = arith.constant 0 : index
    %344 = vector.load %arg10[%c0_79, %c0_80] : memref<32x64xf32, #tpu.memory_space<vmem>>, vector<32x64xf32>
    %cst_81 = arith.constant dense<0.000000e+00> : vector<16x64xf32>
    %345 = tpu.matmul %343, %344, %cst_81 {dimension_numbers = #tpu.dot_dimension_numbers<[1], [0], [0], [1], [0, 0, 1, 1], [], []>} : vector<16x32xf32>, vector<32x64xf32>, vector<16x64xf32> -> vector<16x64xf32>
    %c0_82 = arith.constant 0 : index
    %c0_83 = arith.constant 0 : index
    %346 = vector.load %arg11[%c0_82, %c0_83] : memref<1x64xf32, #tpu.memory_space<vmem>>, vector<1x64xf32>
    %347 = vector.broadcast %346 : vector<1x64xf32> to vector<16x64xf32>
    %348 = arith.addf %345, %347 : vector<16x64xf32>
    %cst_84 = arith.constant 0.000000e+00 : f32
    %349 = vector.broadcast %cst_84 : f32 to vector<16x64xf32>
    %350 = arith.maximumf %348, %349 : vector<16x64xf32>
    %c0_85 = arith.constant 0 : index
    %c0_86 = arith.constant 0 : index
    %351 = vector.load %arg12[%c0_85, %c0_86] : memref<64x32xf32, #tpu.memory_space<vmem>>, vector<64x32xf32>
    %cst_87 = arith.constant dense<0.000000e+00> : vector<16x32xf32>
    %352 = tpu.matmul %350, %351, %cst_87 {dimension_numbers = #tpu.dot_dimension_numbers<[1], [0], [0], [1], [0, 0, 1, 1], [], []>} : vector<16x64xf32>, vector<64x32xf32>, vector<16x32xf32> -> vector<16x32xf32>
    %353 = arith.addf %320, %352 : vector<16x32xf32>
    %c0_88 = arith.constant 0 : index
    %c0_89 = arith.constant 0 : index
    %354 = vector.load %arg13[%c0_88, %c0_89] : memref<1x32xf32, #tpu.memory_space<vmem>>, vector<1x32xf32>
    %355 = vector.broadcast %354 : vector<1x32xf32> to vector<16x32xf32>
    %356 = arith.addf %353, %355 : vector<16x32xf32>
    %c0_90 = arith.constant 0 : index
    %c0_91 = arith.constant 0 : index
    %357 = vector.load %arg14[%c0_90, %c0_91] : memref<16x32xf32, #tpu.memory_space<vmem>>, vector<16x32xf32>
    tpu.vector_store %arg14[%c0_90, %c0_91], %356 {strides = array<i32>} : memref<16x32xf32, #tpu.memory_space<vmem>>, vector<16x32xf32>,
    return
  }
}

</mosaic_0001>

<bundles_post_ra>
// kernel: encoder_layer.1
= control target key start
LH: loop header
LB: loop body
LE: loop exit
PB: predicated region body
PF: predicated region fallthrough
CT: control target
= control target key end

     0   :  { %19 = vsyncpa [#allocation3], 0  ;;  %s2755_s0 = inlined_call_operand.vmem [shape: f32[16,32], index: 0, kind: input, shape index: {}]   ;;  %s2756_s1 = inlined_call_operand.vmem [shape: f32[16,16], index: 1, kind: input, shape index: {}]   ;;  %s2757_s2 = inlined_call_operand.hbm [shape: f32[224,32], index: 2, kind: input, shape index: {}]   ;;  %s2758_s3 = inlined_call_operand.vmem [shape: f32[1,32], index: 3, kind: input, shape index: {}]   ;;  %s2759_s4 = inlined_call_operand.vmem [shape: f32[6,32], index: 4, kind: input, shape index: {}]   ;;  %s2760_s5 = inlined_call_operand.vmem [shape: f32[6,32], index: 5, kind: input, shape index: {}]   ;;  %s2761_s6 = inlined_call_operand.vmem [shape: f32[32,96], index: 6, kind: input, shape index: {}]   ;;  %s2762_s7 = inlined_call_operand.vmem [shape: f32[1,96], index: 7, kind: input, shape index: {}]   ;;  %s2763_s8 = inlined_call_operand.vmem [shape: f32[32,32], index: 8, kind: input, shape index: {}]   ;;  %s2764_s9 = inlined_call_operand.vmem [shape: f32[1,32], index: 9, kind: input, shape index: {}]   ;;  %s2765_s10 = inlined_call_operand.vmem [shape: f32[32,64], index: 10, kind: input, shape index: {}]   ;;  %s2766_s11 = inlined_call_operand.vmem [shape: f32[1,64], index: 11, kind: input, shape index: {}]   ;;  %s2767_s12 = inlined_call_operand.vmem [shape: f32[64,32], index: 12, kind: input, shape index: {}]   ;;  %s2768_s13 = inlined_call_operand.vmem [shape: f32[1,32], index: 13, kind: input, shape index: {}]   ;;  %s2769_s14 = inlined_call_operand.hbm [shape: f32[16,32], index: 14, kind: output, shape index: {}]  }
   0x1   :  { %20 = vsyncpa [#allocation4], 0  ;;  %s29_s15 = sshll.u32 %s2757_s2, 4  ;;  %s1948_s16 = smov [#allocation2]   ;;  %s30_s15 = int_to_ptr.hbm [resolvable:$true] %s29_s15 }
   0x2   :  { %s31_s17 = sshll.u32 %s1948_s16, 4  ;;  %s1949_s18 = smov 128   ;;  %s32_s17 = int_to_ptr.vmem [resolvable:$true] %s31_s17 }
   0x3   :  { %s1950_s19 = smov 8  }
   0x4   :  { %37 = dma.hbm_to_vmem [thread:$0]  %s30_s15, 3584, %s32_s17, [#allocation3], %s1949_s18, %s1949_s18, %s1950_s19  }
   0x5   :  { %1944 = dma.done.wait [#allocation3], 3584  }
   0x6   :  { %1945 = vsyncadd [#allocation3], 4294963712  ;;  %vm103_vm0 = vcmask 261120   ;;  %v2049_v0 = vld [vmem:[%s2755_s0] sm:$0xff]  ;;  %v2056_v2 = vld [vmem:[%s2755_s0 + $0x8] sm:$0xff]  ;;  %v1951_v4 = vmov 32.0  }
   0x7   :  { %v104_v1 = vsel %vm103_vm0, %v2049_v0, 0.0  ;;  %v107_v3 = vsel %vm103_vm0, %v2056_v2, 0.0  ;;  %1812 = vrcp.f32 %v1951_v4  ;;  %v2071_v43 = vld [vmem:[%s2759_s4] sm:$0x3f]  ;;  %vm170_vm6 = vcmask 1042432   ;;  %s1952_s26 = smov 96  }
   0x8   :  { %105 = vadd.xlane.f32.xlu0 %v104_v1  ;;  %v2076_v46 = vld [vmem:[%s2760_s5] sm:$0x3f]  ;;  %v161_v48 = vperm.slane %v2071_v43, 0  ;;  %vm189_vm7 = vcmask 1044480   ;;  %s1953_s27 = smov 32   ;;  %vm175_vm8 = vcmask 1046528  }
   0x9   :  { %v164_v52 = vperm.slane %v2076_v46, 0  ;;  %vm207_vm9 = vcmask 1041408   ;;  %s1954_s28 = smov 64   ;;  %vm182_vm10 = vcmask 1045504   ;;  %vm196_vm11 = vcmask 1043456   ;;  %s1955_s29 = smov 88  }
   0xa   :  { %vm215_vm12 = vcmask 523264   ;;  %vm217_vm13 = vcmask 785408   ;;  %s1957_s30 = smov 72   ;;  %s1959_s15 = smov 104  }
   0xb   :  { %s1963_s20 = smov 48  }
   0xd   :  { %v1813_v5 = vpop.eup %1812 }
   0xe   :  { %v111_v6 = vmul.f32 32.0, %v1813_v5  ;;  %vm115_vm1 = vweird.f32 %v1813_v5 }
  0x10   :  { %108 = vadd.xlane.f32.xlu0 %v107_v3  ;;  %v112_v7 = vsub.f32 1.0, %v111_v6 }
  0x12   :  { %v113_v8 = vmul.f32 %v1813_v5, %v112_v7 }
  0x14   :  { %v114_v9 = vadd.f32 %v1813_v5, %v113_v8 }
  0x16   :  { %v2060_v10 = vsel %vm115_vm1, %v1813_v5, %v114_v9 }
  0x7b   :  { %v106_v11 = vpop.xlane.xlu0 %105 }
  0x7c   :  { %v117_v12 = vmul.f32 %v2060_v10, %v106_v11 }
  0x7e   :  { %v119_v13 = vsub.f32 %v2049_v0, %v117_v12 }
  0x80   :  { %v121_v14 = vmul.f32 %v119_v13, %v119_v13 }
  0x82   :  { %v123_v15 = vsel %vm103_vm0, %v121_v14, 0.0 }
  0x83   :  { %124 = vadd.xlane.f32.xlu1 %v123_v15  ;;  %v109_v16 = vpop.xlane.xlu0 %108 }
  0x84   :  { %v118_v17 = vmul.f32 %v2060_v10, %v109_v16 }
  0x86   :  { %v120_v18 = vsub.f32 %v2056_v2, %v118_v17 }
  0x88   :  { %v122_v19 = vmul.f32 %v120_v18, %v120_v18 }
  0x8a   :  { %v126_v20 = vsel %vm103_vm0, %v122_v19, 0.0 }
  0x8b   :  { %127 = vadd.xlane.f32.xlu1 %v126_v20 }
  0xf6   :  { %v125_v21 = vpop.xlane.xlu1 %124 }
  0xf7   :  { %v129_v22 = vmul.f32 0.032258064, %v125_v21 }
  0xf9   :  { %1814 = vrsqrt.f32 %v129_v22  ;;  %vm138_vm2 = vcmp.eq.f32.partialorder %v129_v22, inf  ;;  %v141_v35 = vand.u32 2147483648, %v129_v22  ;;  %vm140_vm3 = vcmp.eq.f32.partialorder %v129_v22, 0.0 }
  0xfe   :  { %v128_v23 = vpop.xlane.xlu1 %127 }
  0xff   :  { %v1815_v24 = vpop.eup %1814  ;;  %v130_v25 = vmul.f32 0.032258064, %v128_v23  ;;  %v2115_v23 = vld [vmem:[#allocation2 + $0x70] sm:$0xff] }
 0x100   :  { %v132_v26 = vmul.f32 %v1815_v24, %v129_v22 }
 0x101   :  { %1816 = vrsqrt.f32 %v130_v25  ;;  %vm150_vm4 = vcmp.eq.f32.partialorder %v130_v25, inf  ;;  %v153_v44 = vand.u32 2147483648, %v130_v25  ;;  %vm152_vm5 = vcmp.eq.f32.partialorder %v130_v25, 0.0 }
 0x102   :  { %v133_v27 = vmul.f32 %v1815_v24, %v132_v26  ;;  %v2121_v26 = vld [vmem:[#allocation2 + $0x68] sm:$0xff] }
 0x104   :  { %v134_v28 = vmul.f32 0.5, %v133_v27  ;;  %v2123_v27 = vld [vmem:[#allocation2 + $0xd8] sm:$0xff] }
 0x105   :  { %303 = vmatpush.msra.mxu1 %v2123_v27  ;;  %507 = vmatpush.msra.mxu3 %v2123_v27 }
 0x106   :  { %v135_v29 = vsub.f32 1.5, %v134_v28  ;;  %v2125_v28 = vld [vmem:[#allocation2 + $0xd0] sm:$0xff] }
 0x107   :  { %v1817_v30 = vpop.eup %1816  ;;  %304 = vmatpush.msra.mxu1 %v2125_v28  ;;  %508 = vmatpush.msra.mxu3 %v2125_v28 }
 0x108   :  { %v136_v31 = vmul.f32 %v1815_v24, %v135_v29  ;;  %v144_v32 = vmul.f32 %v1817_v30, %v130_v25 }
 0x10a   :  { %v137_v33 = vmul.f32 %v136_v31, %v129_v22  ;;  %v145_v34 = vmul.f32 %v1817_v30, %v144_v32  ;;  %v2132_v31 = vld [vmem:[#allocation2 + $0xc8] sm:$0xff] }
 0x10b   :  { %305 = vmatpush.msra.mxu1 %v2132_v31  ;;  %509 = vmatpush.msra.mxu3 %v2132_v31 }
 0x10c   :  { %v139_v36 = vsel %vm138_vm2, %v129_v22, %v137_v33  ;;  %v146_v37 = vmul.f32 0.5, %v145_v34  ;;  %v2113_v22 = vld [vmem:[#allocation2 + $0x78] sm:$0xff] }
 0x10d   :  { %v142_v38 = vsel %vm140_vm3, %v141_v35, %v139_v36  ;;  %276 = vmatpush.msra.mxu0 %v2113_v22  ;;  %480 = vmatpush.msra.mxu2 %v2113_v22  ;;  %v2139_v34 = vld [vmem:[#allocation2 + $0x58] sm:$0xff]  ;;  %v2146_v35 = vld [vmem:[#allocation2 + $0x50] sm:$0xff]  ;;  %v2151_v36 = vld [vmem:[#allocation2 + $0x48] sm:$0xff] }
 0x10e   :  { %v155_v39 = vadd.f32 1e-06, %v142_v38  ;;  %v147_v40 = vsub.f32 1.5, %v146_v37 }
 0x10f   :  { %277 = vmatpush.msra.mxu0 %v2115_v23  ;;  %481 = vmatpush.msra.mxu2 %v2115_v23 }
 0x110   :  { %1818 = vrcp.f32 %v155_v39  ;;  %v148_v41 = vmul.f32 %v1817_v30, %v147_v40  ;;  %v2130_v30 = vld [vmem:[#allocation2 + $0x60] sm:$0xff] }
 0x111   :  { %278 = vmatpush.msra.mxu0 %v2121_v26  ;;  %482 = vmatpush.msra.mxu2 %v2121_v26  ;;  %v2157_v39 = vld [vmem:[#allocation2 + $0x40] sm:$0xff] }
 0x112   :  { %v149_v42 = vmul.f32 %v148_v41, %v130_v25 }
 0x113   :  { %279 = vmatpush.msra.mxu0 %v2130_v30  ;;  %483 = vmatpush.msra.mxu2 %v2130_v30 }
 0x114   :  { %v151_v45 = vsel %vm150_vm4, %v130_v25, %v149_v42 }
 0x115   :  { %v154_v47 = vsel %vm152_vm5, %v153_v44, %v151_v45  ;;  %280 = vmatpush.msra.mxu0 %v2139_v34  ;;  %484 = vmatpush.msra.mxu2 %v2139_v34 }
 0x116   :  { %v1819_v49 = vpop.eup %1818  ;;  %v156_v50 = vadd.f32 1e-06, %v154_v47 }
 0x117   :  { %v159_v51 = vmul.f32 %v1819_v49, %v119_v13  ;;  %281 = vmatpush.msra.mxu0 %v2146_v35  ;;  %485 = vmatpush.msra.mxu2 %v2146_v35  ;;  %v2174_v49 = vld [vmem:[#allocation2 + $0x38] sm:$0xff] }
 0x118   :  { %1820 = vrcp.f32 %v156_v50  ;;  %v2176_v50 = vld [vmem:[#allocation2 + $0xc0] sm:$0xff] }
 0x119   :  { %v162_v53 = vmul.f32 %v161_v48, %v159_v51  ;;  %282 = vmatpush.msra.mxu0 %v2151_v36  ;;  %486 = vmatpush.msra.mxu2 %v2151_v36  ;;  %v2178_v51 = vld [vmem:[#allocation2 + $0x30] sm:$0xff] }
 0x11a   :  { %306 = vmatpush.msra.mxu1 %v2176_v50  ;;  %510 = vmatpush.msra.mxu3 %v2176_v50 }
 0x11b   :  { %v165_v54 = vadd.f32 %v164_v52, %v162_v53  ;;  %283 = vmatpush.msra.mxu0 %v2157_v39  ;;  %487 = vmatpush.msra.mxu2 %v2157_v39  ;;  %v2184_v53 = vld [vmem:[#allocation2 + $0x28] sm:$0xff] }
 0x11d   :  { %v168_v55 = vrot.slane %v165_v54, 5  ;;  %284 = vmatpush.msra.mxu0 %v2174_v49  ;;  %v2186_v54 = vld [vmem:[#allocation2 + $0xb0] sm:$0xff]  ;;  %488 = vmatpush.msra.mxu2 %v2174_v49 }
 0x11e   :  { %v1821_v56 = vpop.eup %1820 }
 0x11f   :  { %v2081_v57 = vsel %vm170_vm6, 0.0, %v168_v55  ;;  %v2084_v58 = vsel %vm170_vm6, %v168_v55, 0.0  ;;  %v160_v59 = vmul.f32 %v1821_v56, %v120_v18  ;;  %285 = vmatpush.msra.mxu0 %v2178_v51  ;;  %v2192_v55 = vld [vmem:[#allocation2 + $0x20] sm:$0xff]  ;;  %v2194_v56 = vld [vmem:[#allocation2 + $0xa8] sm:$0xff]  ;;  %489 = vmatpush.msra.mxu2 %v2178_v51 }
 0x120   :  { %v190_v60 = vrot.slane %v2081_v57, 3  ;;  %v191_v61 = vrot.slane %v2084_v58, 3  ;;  %v201_v62 = vrot.slane %v2081_v57, 5  ;;  %v202_v63 = vrot.slane %v2084_v58, 5 }
 0x121   :  { %v163_v1 = vmul.f32 %v161_v48, %v160_v59  ;;  %v176_v7 = vrot.slane %v2081_v57, 1  ;;  %v177_v8 = vrot.slane %v2084_v58, 1  ;;  %v183_v24 = vrot.slane %v2081_v57, 2  ;;  %286 = vmatpush.msra.mxu0 %v2184_v53  ;;  %490 = vmatpush.msra.mxu2 %v2184_v53  ;;  %v2204_v59 = vld [vmem:[#allocation2 + $0x18] sm:$0xff] }
 0x122   :  { %v192_v3 = vsel %vm189_vm7, %v190_v60, %v191_v61  ;;  %v203_v4 = vsel %vm170_vm6, %v201_v62, %v202_v63  ;;  %v184_v25 = vrot.slane %v2084_v58, 2  ;;  %v208_v37 = vrot.slane %v2081_v57, 6  ;;  %v88_v60 = vld [vmem:[#allocation2 + $0xa0] sm:$0xff]  ;;  %v2206_v61 = vld [vmem:[#allocation2 + $0x10] sm:$0xff]  ;;  %v87_v62 = vld [vmem:[#allocation2 + $0x98] sm:$0xff] }
 0x123   :  { %193 = vrot.lane.b32.xlu0 %v192_v3, %s1952_s26  ;;  %204 = vrot.lane.b32.xlu1 %v203_v4, %s1953_s27  ;;  %v166_v5 = vadd.f32 %v164_v52, %v163_v1  ;;  %v178_v17 = vsel %vm175_vm8, %v176_v7, %v177_v8  ;;  %v209_v38 = vrot.slane %v2084_v58, 6  ;;  %v2182_v52 = vld [vmem:[#allocation2 + $0xb8] sm:$0xff]  ;;  %v2211_v63 = vld [vmem:[#allocation2 + $0x8] sm:$0xff]  ;;  %v86_v1 = vld [vmem:[#allocation2 + $0x90] sm:$0xff] }
 0x124   :  { %v185_v32 = vsel %vm182_vm10, %v183_v24, %v184_v25  ;;  %307 = vmatpush.msra.mxu1 %v2182_v52  ;;  %511 = vmatpush.msra.mxu3 %v2182_v52  ;;  %v2217_v3 = vld [vmem:[#allocation2] sm:$0xff]  ;;  %v85_v4 = vld [vmem:[#allocation2 + $0x88] sm:$0xff] }
 0x125   :  { %v222_v6 = vrot.slane %v166_v5, 5  ;;  %v210_v40 = vsel %vm207_vm9, %v208_v37, %v209_v38  ;;  %287 = vmatpush.msra.mxu0 %v2192_v55  ;;  %491 = vmatpush.msra.mxu2 %v2192_v55  ;;  %v84_v5 = vld [vmem:[#allocation2 + $0x80] sm:$0xff] }
 0x126   :  { %308 = vmatpush.msra.mxu1 %v2186_v54  ;;  %512 = vmatpush.msra.mxu3 %v2186_v54 }
 0x127   :  { %v2097_v9 = vsel %vm170_vm6, 0.0, %v222_v6  ;;  %v2100_v11 = vsel %vm170_vm6, %v222_v6, 0.0  ;;  %288 = vmatpush.msra.mxu0 %v2204_v59  ;;  %492 = vmatpush.msra.mxu2 %v2204_v59 }
 0x128   :  { %v256_v12 = vrot.slane %v2097_v9, 6  ;;  %v257_v13 = vrot.slane %v2100_v11, 6  ;;  %v228_v14 = vrot.slane %v2097_v9, 1  ;;  %v229_v15 = vrot.slane %v2100_v11, 1  ;;  %309 = vmatpush.msra.mxu1 %v2194_v56  ;;  %513 = vmatpush.msra.mxu3 %v2194_v56 }
 0x129   :  { %v234_v20 = vrot.slane %v2097_v9, 2  ;;  %v235_v21 = vrot.slane %v2100_v11, 2  ;;  %v240_v41 = vrot.slane %v2097_v9, 3  ;;  %v241_v42 = vrot.slane %v2100_v11, 3  ;;  %289 = vmatpush.msra.mxu0 %v2206_v61  ;;  %493 = vmatpush.msra.mxu2 %v2206_v61 }
 0x12a   :  { %v258_v16 = vsel %vm207_vm9, %v256_v12, %v257_v13  ;;  %v230_v18 = vsel %vm175_vm8, %v228_v14, %v229_v15  ;;  %v250_v45 = vrot.slane %v2097_v9, 5  ;;  %v251_v47 = vrot.slane %v2100_v11, 5  ;;  %310 = vmatpush.msra.mxu1 %v88_v60  ;;  %514 = vmatpush.msra.mxu3 %v88_v60 }
 0x12b   :  { %259 = vrot.lane.b32.xlu0 %v258_v16, %s1954_s28  ;;  %v1767_v19 = vpack.i.bf16 %v230_v18, %v178_v17  ;;  %v236_v29 = vsel %vm182_vm10, %v234_v20, %v235_v21  ;;  %v242_v44 = vsel %vm189_vm7, %v240_v41, %v241_v42  ;;  %290 = vmatpush.msra.mxu0 %v2211_v63  ;;  %v197_v13 = vrot.slane %v2081_v57, 4 }
 0x12c   :  { %v1772_v33 = vpack.i.bf16 %v236_v29, %v185_v32  ;;  %v252_v48 = vsel %vm170_vm6, %v250_v45, %v251_v47  ;;  %311 = vmatpush.msra.mxu1 %v87_v62  ;;  %515 = vmatpush.msra.mxu3 %v87_v62  ;;  %v198_v14 = vrot.slane %v2084_v58, 4  ;;  %v247_v29 = vrot.slane %v2100_v11, 4 }
 0x12d   :  { %1768 = vrot.lane.b32.xlu2 %v1767_v19, %s1953_s27  ;;  %494 = vmatpush.msra.mxu2 %v2211_v63 }
 0x12e   :  { %312 = vmatpush.msra.mxu1 %v86_v1  ;;  %516 = vmatpush.msra.mxu3 %v86_v1  ;;  %v199_v16 = vsel %vm196_vm11, %v197_v13, %v198_v14 }
 0x12f   :  { %291 = vmatpush.msra.mxu0 %v2217_v3  ;;  %495 = vmatpush.msra.mxu2 %v2217_v3 }
 0x130   :  { %313 = vmatpush.msra.mxu1 %v85_v4  ;;  %517 = vmatpush.msra.mxu3 %v85_v4 }
 0x131   :  { %888 = vmatpush.msrb.mxu0 %v2113_v22  ;;  %915 = vmatpush.msrb.mxu2 %v2123_v27 }
 0x132   :  { %314 = vmatpush.msra.mxu1 %v84_v5  ;;  %518 = vmatpush.msra.mxu3 %v84_v5 }
 0x133   :  { %889 = vmatpush.msrb.mxu0 %v2115_v23  ;;  %916 = vmatpush.msrb.mxu2 %v2125_v28 }
 0x134   :  { %684 = vmatpush.msrb.mxu1 %v2113_v22  ;;  %711 = vmatpush.msrb.mxu3 %v2123_v27 }
 0x135   :  { %1773 = vrot.lane.b32.xlu2 %v1772_v33, %s1954_s28  ;;  %890 = vmatpush.msrb.mxu0 %v2121_v26 }
 0x136   :  { %685 = vmatpush.msrb.mxu1 %v2115_v23  ;;  %712 = vmatpush.msrb.mxu3 %v2125_v28  ;;  %v246_v28 = vrot.slane %v2097_v9, 4 }
 0x137   :  { %917 = vmatpush.msrb.mxu2 %v2132_v31  ;;  %891 = vmatpush.msrb.mxu0 %v2130_v30 }
 0x138   :  { %686 = vmatpush.msrb.mxu1 %v2121_v26  ;;  %713 = vmatpush.msrb.mxu3 %v2132_v31 }
 0x139   :  { %918 = vmatpush.msrb.mxu2 %v2176_v50  ;;  %892 = vmatpush.msrb.mxu0 %v2139_v34 }
 0x13a   :  { %687 = vmatpush.msrb.mxu1 %v2130_v30  ;;  %714 = vmatpush.msrb.mxu3 %v2176_v50  ;;  %v248_v30 = vsel %vm196_vm11, %v246_v28, %v247_v29 }
 0x13b   :  { %919 = vmatpush.msrb.mxu2 %v2182_v52  ;;  %893 = vmatpush.msrb.mxu0 %v2146_v35 }
 0x13c   :  { %688 = vmatpush.msrb.mxu1 %v2139_v34  ;;  %715 = vmatpush.msrb.mxu3 %v2182_v52 }
 0x13d   :  { %211 = vrot.lane.b32.xlu2 %v210_v40, %s1954_s28  ;;  %920 = vmatpush.msrb.mxu2 %v2186_v54 }
 0x13e   :  { %689 = vmatpush.msrb.mxu1 %v2146_v35  ;;  %716 = vmatpush.msrb.mxu3 %v2186_v54  ;;  %v2291_v35 = vld [vmem:[%s2758_s3] ss:$0 sm:$0xff]  ;;  %s1958_s3 = smov 80  }
 0x13f   :  { %894 = vmatpush.msrb.mxu0 %v2151_v36  ;;  %921 = vmatpush.msrb.mxu2 %v2194_v56 }
 0x140   :  { %690 = vmatpush.msrb.mxu1 %v2151_v36  ;;  %717 = vmatpush.msrb.mxu3 %v2194_v56 }
 0x141   :  { %895 = vmatpush.msrb.mxu0 %v2157_v39  ;;  %922 = vmatpush.msrb.mxu2 %v88_v60 }
 0x142   :  { %691 = vmatpush.msrb.mxu1 %v2157_v39  ;;  %718 = vmatpush.msrb.mxu3 %v88_v60 }
 0x143   :  { %896 = vmatpush.msrb.mxu0 %v2174_v49  ;;  %923 = vmatpush.msrb.mxu2 %v87_v62 }
 0x144   :  { %692 = vmatpush.msrb.mxu1 %v2174_v49  ;;  %719 = vmatpush.msrb.mxu3 %v87_v62 }
 0x145   :  { %243 = vrot.lane.b32.xlu2 %v242_v44, %s1952_s26  ;;  %897 = vmatpush.msrb.mxu0 %v2178_v51 }
 0x146   :  { %693 = vmatpush.msrb.mxu1 %v2178_v51  ;;  %720 = vmatpush.msrb.mxu3 %v86_v1 }
 0x147   :  { %924 = vmatpush.msrb.mxu2 %v86_v1  ;;  %898 = vmatpush.msrb.mxu0 %v2184_v53 }
 0x148   :  { %694 = vmatpush.msrb.mxu1 %v2184_v53  ;;  %721 = vmatpush.msrb.mxu3 %v85_v4 }
 0x149   :  { %925 = vmatpush.msrb.mxu2 %v85_v4  ;;  %899 = vmatpush.msrb.mxu0 %v2192_v55 }
 0x14a   :  { %695 = vmatpush.msrb.mxu1 %v2192_v55  ;;  %722 = vmatpush.msrb.mxu3 %v84_v5 }
 0x14b   :  { %926 = vmatpush.msrb.mxu2 %v84_v5  ;;  %900 = vmatpush.msrb.mxu0 %v2204_v59 }
 0x14c   :  { %696 = vmatpush.msrb.mxu1 %v2204_v59 }
 0x14d   :  { %253 = vrot.lane.b32.xlu2 %v252_v48, %s1953_s27  ;;  %901 = vmatpush.msrb.mxu0 %v2206_v61 }
 0x14e   :  { %697 = vmatpush.msrb.mxu1 %v2206_v61 }
 0x14f   :  { %902 = vmatpush.msrb.mxu0 %v2211_v63 }
 0x150   :  { %698 = vmatpush.msrb.mxu1 %v2211_v63 }
 0x151   :  { %903 = vmatpush.msrb.mxu0 %v2217_v3 }
 0x152   :  { %699 = vmatpush.msrb.mxu1 %v2217_v3 }
 0x187   :  { %v1769_v6 = vpop.permute.xlu2 %1768 }
 0x188   :  { %v1770_v8 = vunpack.i.l.bf16 %v1769_v6  ;;  %v1771_v22 = vunpack.i.h.bf16 %v1769_v6 }
 0x18a   :  { %v214_v15 = vsel %vm103_vm0, %v2081_v57, %v1770_v8  ;;  %v262_v24 = vsel %vm103_vm0, %v2097_v9, %v1771_v22  ;;  %v379_v22 = vperm.slane %v2076_v46, 1 }
 0x18f   :  { %v1774_v7 = vpop.permute.xlu2 %1773 }
 0x190   :  { %v1775_v12 = vunpack.i.l.bf16 %v1774_v7  ;;  %v1776_v23 = vunpack.i.h.bf16 %v1774_v7 }
 0x192   :  { %v216_v18 = vsel %vm215_vm12, %v214_v15, %v1775_v12  ;;  %v263_v26 = vsel %vm215_vm12, %v262_v24, %v1776_v23 }
 0x195   :  { %v205_v17 = vpop.permute.xlu1 %204  ;;  %v194_v58 = vpop.permute.xlu0 %193 }
 0x196   :  { %v219_v19 = vsel %vm103_vm0, %v199_v16, %v205_v17  ;;  %v218_v20 = vsel %vm217_vm13, %v216_v18, %v194_v58 }
 0x197   :  { %v212_v21 = vpop.permute.xlu2 %211  ;;  %292 = vmatmul.f32.vlgmr.msra.gmra.mxu0 %v218_v20 }
 0x198   :  { %v220_v57 = vsel %vm215_vm12, %v219_v19, %v212_v21  ;;  %v376_v19 = vperm.slane %v2071_v43, 1 }
 0x199   :  { %1704 = vmatmul.msk.f32.vlgmr.msra.gmra.mxu1 %vm217_vm13, %v220_v57 }
 0x19d   :  { %v260_v32 = vpop.permute.xlu0 %259 }
 0x19f   :  { %v244_v25 = vpop.permute.xlu2 %243 }
 0x1a0   :  { %v264_v27 = vsel %vm217_vm13, %v263_v26, %v244_v25 }
 0x1a1   :  { %295 = vmatmul.f32.gmra.mxu0 %v264_v27 }
 0x1a7   :  { %v254_v31 = vpop.permute.xlu2 %253 }
 0x1a8   :  { %v265_v33 = vsel %vm103_vm0, %v248_v30, %v254_v31 }
 0x1a9   :  { %v266_v34 = vsel %vm215_vm12, %v265_v33, %v260_v32 }
 0x1aa   :  { %1705 = vmatmul.msk.f32.gmra.mxu1 %vm217_vm13, %v266_v34 }
 0x214   :  { %v293_v36 = vpop.f32.mrf.mxu0 }
 0x215   :  { %v294_v9 = vadd.f32 %v2291_v35, %v293_v36 }
 0x216   :  { %v316_v37 = vpop.f32.mrf.mxu1 }
 0x217   :  { %v317_v11 = vadd.f32 %v316_v37, %v294_v9 }
 0x219   :  { %v322_v38 = vmax.f32 %v317_v11, 0.0 }
 0x21b   :  { %v2295_v39 = vadd.f32 %v322_v38, %v2049_v0 }
 0x21d   :  { %v326_v40 = vsel %vm103_vm0, %v2295_v39, 0.0 }
 0x21e   :  { %327 = vadd.xlane.f32.xlu2 %v326_v40  ;;  %v296_v41 = vpop.f32.mrf.mxu0 }
 0x21f   :  { %v297_v42 = vadd.f32 %v2291_v35, %v296_v41 }
 0x227   :  { %v319_v44 = vpop.f32.mrf.mxu1 }
 0x228   :  { %v320_v45 = vadd.f32 %v319_v44, %v297_v42 }
 0x22a   :  { %v323_v47 = vmax.f32 %v320_v45, 0.0 }
 0x22c   :  { %v2301_v48 = vadd.f32 %v323_v47, %v2056_v2 }
 0x22e   :  { %v329_v49 = vsel %vm103_vm0, %v2301_v48, 0.0 }
 0x22f   :  { %330 = vadd.xlane.f32.xlu1 %v329_v49 }
 0x291   :  { %v328_v50 = vpop.xlane.xlu2 %327 }
 0x292   :  { %v332_v0 = vmul.f32 %v328_v50, %v2060_v10 }
 0x294   :  { %v334_v51 = vsub.f32 %v2295_v39, %v332_v0 }
 0x296   :  { %v336_v52 = vmul.f32 %v334_v51, %v334_v51 }
 0x298   :  { %v338_v53 = vsel %vm103_vm0, %v336_v52, 0.0 }
 0x299   :  { %339 = vadd.xlane.f32.xlu0 %v338_v53 }
 0x2a2   :  { %v331_v54 = vpop.xlane.xlu1 %330 }
 0x2a3   :  { %v333_v55 = vmul.f32 %v331_v54, %v2060_v10 }
 0x2a5   :  { %v335_v56 = vsub.f32 %v2301_v48, %v333_v55 }
 0x2a7   :  { %v337_v2 = vmul.f32 %v335_v56, %v335_v56 }
 0x2a9   :  { %v341_v59 = vsel %vm103_vm0, %v337_v2, 0.0 }
 0x2aa   :  { %342 = vadd.xlane.f32.xlu2 %v341_v59 }
 0x30c   :  { %v340_v60 = vpop.xlane.xlu0 %339 }
 0x30d   :  { %v344_v61 = vmul.f32 0.032258064, %v340_v60 }
 0x30f   :  { %1822 = vrsqrt.f32 %v344_v61  ;;  %vm353_vm14 = vcmp.eq.f32.partialorder %v344_v61, inf  ;;  %v356_v12 = vand.u32 2147483648, %v344_v61  ;;  %vm355_vm15 = vcmp.eq.f32.partialorder %v344_v61, 0.0 }
 0x315   :  { %v1823_v62 = vpop.eup %1822 }
 0x316   :  { %v347_v63 = vmul.f32 %v1823_v62, %v344_v61 }
 0x318   :  { %v348_v1 = vmul.f32 %v1823_v62, %v347_v63 }
 0x31a   :  { %v349_v3 = vmul.f32 0.5, %v348_v1 }
 0x31c   :  { %v350_v4 = vsub.f32 1.5, %v349_v3 }
 0x31d   :  { %v343_v5 = vpop.xlane.xlu2 %342 }
 0x31e   :  { %v351_v6 = vmul.f32 %v1823_v62, %v350_v4  ;;  %v345_v7 = vmul.f32 0.032258064, %v343_v5 }
 0x320   :  { %v352_v8 = vmul.f32 %v351_v6, %v344_v61  ;;  %1824 = vrsqrt.f32 %v345_v7  ;;  %vm365_vm1 = vcmp.eq.f32.partialorder %v345_v7, inf  ;;  %v368_v27 = vand.u32 2147483648, %v345_v7 }
 0x321   :  { %vm367_vm2 = vcmp.eq.f32.partialorder %v345_v7, 0.0 }
 0x322   :  { %v354_v13 = vsel %vm353_vm14, %v344_v61, %v352_v8 }
 0x323   :  { %v357_v14 = vsel %vm355_vm15, %v356_v12, %v354_v13 }
 0x324   :  { %v370_v15 = vadd.f32 1e-06, %v357_v14 }
 0x326   :  { %v1825_v16 = vpop.eup %1824  ;;  %1826 = vrcp.f32 %v370_v15 }
 0x327   :  { %v359_v17 = vmul.f32 %v1825_v16, %v345_v7 }
 0x329   :  { %v360_v58 = vmul.f32 %v1825_v16, %v359_v17 }
 0x32b   :  { %v361_v18 = vmul.f32 0.5, %v360_v58 }
 0x32c   :  { %v1827_v20 = vpop.eup %1826 }
 0x32d   :  { %v362_v21 = vsub.f32 1.5, %v361_v18  ;;  %v374_v57 = vmul.f32 %v1827_v20, %v334_v51 }
 0x32f   :  { %v363_v23 = vmul.f32 %v1825_v16, %v362_v21  ;;  %v377_v24 = vmul.f32 %v376_v19, %v374_v57 }
 0x331   :  { %v364_v25 = vmul.f32 %v363_v23, %v345_v7  ;;  %v380_v26 = vadd.f32 %v379_v22, %v377_v24 }
 0x333   :  { %v366_v28 = vsel %vm365_vm1, %v345_v7, %v364_v25  ;;  %v383_v29 = vrot.slane %v380_v26, 5 }
 0x334   :  { %v369_v30 = vsel %vm367_vm2, %v368_v27, %v366_v28 }
 0x335   :  { %v371_v31 = vadd.f32 1e-06, %v369_v30  ;;  %v2314_v32 = vsel %vm170_vm6, 0.0, %v383_v29  ;;  %v2317_v33 = vsel %vm170_vm6, %v383_v29, 0.0 }
 0x336   :  { %v401_v34 = vrot.slane %v2314_v32, 3  ;;  %v402_v36 = vrot.slane %v2317_v33, 3  ;;  %v395_v42 = vrot.slane %v2314_v32, 2  ;;  %v396_v44 = vrot.slane %v2317_v33, 2 }
 0x337   :  { %1828 = vrcp.f32 %v371_v31  ;;  %v389_v49 = vrot.slane %v2314_v32, 1  ;;  %v390_v50 = vrot.slane %v2317_v33, 1  ;;  %v411_v1 = vrot.slane %v2314_v32, 5 }
 0x338   :  { %v403_v9 = vsel %vm189_vm7, %v401_v34, %v402_v36  ;;  %v397_v2 = vsel %vm182_vm10, %v395_v42, %v396_v44  ;;  %v412_v3 = vrot.slane %v2317_v33, 5  ;;  %v417_v4 = vrot.slane %v2314_v32, 6 }
 0x339   :  { %404 = vrot.lane.b32.xlu2 %v403_v9, %s1952_s26  ;;  %v391_v61 = vsel %vm175_vm8, %v389_v49, %v390_v50  ;;  %v418_v5 = vrot.slane %v2317_v33, 6  ;;  %v407_v57 = vrot.slane %v2314_v32, 4 }
 0x33a   :  { %v413_v6 = vsel %vm170_vm6, %v411_v1, %v412_v3 }
 0x33b   :  { %v419_v7 = vsel %vm207_vm9, %v417_v4, %v418_v5 }
 0x33d   :  { %v1829_v37 = vpop.eup %1828 }
 0x33e   :  { %v375_v11 = vmul.f32 %v1829_v37, %v335_v56 }
 0x340   :  { %v378_v38 = vmul.f32 %v376_v19, %v375_v11 }
 0x342   :  { %v381_v40 = vadd.f32 %v379_v22, %v378_v38  ;;  %v408_v22 = vrot.slane %v2317_v33, 4 }
 0x344   :  { %v429_v41 = vrot.slane %v381_v40, 5  ;;  %v409_v27 = vsel %vm196_vm11, %v407_v57, %v408_v22 }
 0x346   :  { %v2326_v45 = vsel %vm170_vm6, 0.0, %v429_v41  ;;  %v2329_v47 = vsel %vm170_vm6, %v429_v41, 0.0 }
 0x347   :  { %v447_v0 = vrot.slane %v2326_v45, 3  ;;  %v448_v51 = vrot.slane %v2329_v47, 3  ;;  %v441_v52 = vrot.slane %v2326_v45, 2  ;;  %v442_v53 = vrot.slane %v2329_v47, 2 }
 0x348   :  { %v435_v54 = vrot.slane %v2326_v45, 1  ;;  %v436_v55 = vrot.slane %v2329_v47, 1  ;;  %v457_v8 = vrot.slane %v2326_v45, 5  ;;  %v458_v12 = vrot.slane %v2329_v47, 5 }
 0x349   :  { %v449_v56 = vsel %vm189_vm7, %v447_v0, %v448_v51  ;;  %v443_v59 = vsel %vm182_vm10, %v441_v52, %v442_v53  ;;  %v463_v13 = vrot.slane %v2326_v45, 6  ;;  %v464_v14 = vrot.slane %v2329_v47, 6 }
 0x34a   :  { %450 = vrot.lane.b32.xlu2 %v449_v56, %s1952_s26  ;;  %v1782_v60 = vpack.i.bf16 %v443_v59, %v397_v2  ;;  %v437_v62 = vsel %vm175_vm8, %v435_v54, %v436_v55  ;;  %v459_v15 = vsel %vm170_vm6, %v457_v8, %v458_v12  ;;  %v453_v34 = vrot.slane %v2326_v45, 4 }
 0x34b   :  { %v1777_v63 = vpack.i.bf16 %v437_v62, %v391_v61  ;;  %v465_v16 = vsel %vm207_vm9, %v463_v13, %v464_v14  ;;  %v454_v36 = vrot.slane %v2329_v47, 4 }
 0x34c   :  { %1783 = vrot.lane.b32.xlu0 %v1782_v60, %s1954_s28 }
 0x34d   :  { %1778 = vrot.lane.b32.xlu1 %v1777_v63, %s1953_s27  ;;  %v455_v11 = vsel %vm196_vm11, %v453_v34, %v454_v36 }
 0x354   :  { %414 = vrot.lane.b32.xlu0 %v413_v6, %s1953_s27 }
 0x355   :  { %420 = vrot.lane.b32.xlu1 %v419_v7, %s1954_s28 }
 0x35c   :  { %460 = vrot.lane.b32.xlu0 %v459_v15, %s1953_s27 }
 0x35d   :  { %466 = vrot.lane.b32.xlu1 %v465_v16, %s1954_s28 }
 0x393   :  { %v405_v23 = vpop.permute.xlu2 %404 }
 0x3a4   :  { %v451_v9 = vpop.permute.xlu2 %450 }
 0x3be   :  { %v1784_v17 = vpop.permute.xlu0 %1783 }
 0x3bf   :  { %v1785_v58 = vunpack.i.l.bf16 %v1784_v17  ;;  %v1779_v18 = vpop.permute.xlu1 %1778  ;;  %v1786_v26 = vunpack.i.h.bf16 %v1784_v17 }
 0x3c0   :  { %v1780_v19 = vunpack.i.l.bf16 %v1779_v18  ;;  %v1781_v20 = vunpack.i.h.bf16 %v1779_v18 }
 0x3c2   :  { %v423_v21 = vsel %vm103_vm0, %v2314_v32, %v1780_v19  ;;  %v469_v29 = vsel %vm103_vm0, %v2326_v45, %v1781_v20 }
 0x3c3   :  { %v424_v24 = vsel %vm215_vm12, %v423_v21, %v1785_v58  ;;  %v470_v33 = vsel %vm215_vm12, %v469_v29, %v1786_v26 }
 0x3c4   :  { %v425_v25 = vsel %vm217_vm13, %v424_v24, %v405_v23  ;;  %v471_v37 = vsel %vm217_vm13, %v470_v33, %v451_v9  ;;  %v583_v9 = vperm.slane %v2076_v46, 2 }
 0x3c5   :  { %496 = vmatmul.f32.vlgmr.msra.gmra.mxu2 %v425_v25 }
 0x3c6   :  { %v415_v28 = vpop.permute.xlu0 %414 }
 0x3c7   :  { %v426_v30 = vsel %vm103_vm0, %v409_v27, %v415_v28  ;;  %v421_v31 = vpop.permute.xlu1 %420 }
 0x3c8   :  { %v427_v32 = vsel %vm215_vm12, %v426_v30, %v421_v31 }
 0x3c9   :  { %1706 = vmatmul.msk.f32.vlgmr.msra.gmra.mxu3 %vm217_vm13, %v427_v32  ;;  %v580_v32 = vperm.slane %v2071_v43, 2 }
 0x3cd   :  { %499 = vmatmul.f32.gmra.mxu2 %v471_v37 }
 0x3ce   :  { %v461_v38 = vpop.permute.xlu0 %460 }
 0x3cf   :  { %v472_v40 = vsel %vm103_vm0, %v455_v11, %v461_v38  ;;  %v467_v41 = vpop.permute.xlu1 %466 }
 0x3d0   :  { %v473_v42 = vsel %vm215_vm12, %v472_v40, %v467_v41 }
 0x3d1   :  { %1707 = vmatmul.msk.f32.gmra.mxu3 %vm217_vm13, %v473_v42 }
 0x448   :  { %v497_v44 = vpop.f32.mrf.mxu2 }
 0x449   :  { %v498_v49 = vadd.f32 %v2291_v35, %v497_v44 }
 0x44c   :  { %v520_v45 = vpop.f32.mrf.mxu3 }
 0x44d   :  { %v521_v50 = vadd.f32 %v520_v45, %v498_v49 }
 0x44f   :  { %v526_v47 = vmax.f32 %v521_v50, 0.0 }
 0x450   :  { %v500_v0 = vpop.f32.mrf.mxu2 }
 0x451   :  { %v2385_v51 = vadd.f32 %v526_v47, %v2295_v39  ;;  %v501_v52 = vadd.f32 %v2291_v35, %v500_v0 }
 0x453   :  { %v530_v53 = vsel %vm103_vm0, %v2385_v51, 0.0 }
 0x454   :  { %v523_v54 = vpop.f32.mrf.mxu3  ;;  %531 = vadd.xlane.f32.xlu2 %v530_v53 }
 0x455   :  { %v524_v55 = vadd.f32 %v523_v54, %v501_v52 }
 0x457   :  { %v527_v56 = vmax.f32 %v524_v55, 0.0 }
 0x459   :  { %v2391_v2 = vadd.f32 %v527_v56, %v2301_v48 }
 0x45b   :  { %v533_v59 = vsel %vm103_vm0, %v2391_v2, 0.0 }
 0x45c   :  { %534 = vadd.xlane.f32.xlu0 %v533_v59 }
 0x4c7   :  { %v532_v60 = vpop.xlane.xlu2 %531 }
 0x4c8   :  { %v536_v39 = vmul.f32 %v532_v60, %v2060_v10 }
 0x4ca   :  { %v538_v61 = vsub.f32 %v2385_v51, %v536_v39 }
 0x4cc   :  { %v540_v62 = vmul.f32 %v538_v61, %v538_v61 }
 0x4ce   :  { %v542_v63 = vsel %vm103_vm0, %v540_v62, 0.0 }
 0x4cf   :  { %v535_v1 = vpop.xlane.xlu0 %534  ;;  %543 = vadd.xlane.f32.xlu1 %v542_v63 }
 0x4d0   :  { %v537_v3 = vmul.f32 %v535_v1, %v2060_v10 }
 0x4d2   :  { %v539_v4 = vsub.f32 %v2391_v2, %v537_v3 }
 0x4d4   :  { %v541_v48 = vmul.f32 %v539_v4, %v539_v4 }
 0x4d6   :  { %v545_v5 = vsel %vm103_vm0, %v541_v48, 0.0 }
 0x4d7   :  { %546 = vadd.xlane.f32.xlu2 %v545_v5 }
 0x542   :  { %v544_v6 = vpop.xlane.xlu1 %543 }
 0x543   :  { %v548_v7 = vmul.f32 0.032258064, %v544_v6 }
 0x545   :  { %1830 = vrsqrt.f32 %v548_v7  ;;  %vm557_vm3 = vcmp.eq.f32.partialorder %v548_v7, inf  ;;  %v560_v57 = vand.u32 2147483648, %v548_v7  ;;  %vm559_vm4 = vcmp.eq.f32.partialorder %v548_v7, 0.0 }
 0x54a   :  { %v547_v8 = vpop.xlane.xlu2 %546 }
 0x54b   :  { %v1831_v12 = vpop.eup %1830  ;;  %v549_v13 = vmul.f32 0.032258064, %v547_v8 }
 0x54c   :  { %v551_v14 = vmul.f32 %v1831_v12, %v548_v7 }
 0x54d   :  { %1832 = vrsqrt.f32 %v549_v13  ;;  %vm569_vm5 = vcmp.eq.f32.partialorder %v549_v13, inf  ;;  %v572_v29 = vand.u32 2147483648, %v549_v13  ;;  %vm571_vm14 = vcmp.eq.f32.partialorder %v549_v13, 0.0 }
 0x54e   :  { %v552_v15 = vmul.f32 %v1831_v12, %v551_v14 }
 0x550   :  { %v553_v16 = vmul.f32 0.5, %v552_v15 }
 0x552   :  { %v554_v17 = vsub.f32 1.5, %v553_v16 }
 0x553   :  { %v1833_v58 = vpop.eup %1832 }
 0x554   :  { %v555_v18 = vmul.f32 %v1831_v12, %v554_v17  ;;  %v563_v19 = vmul.f32 %v1833_v58, %v549_v13 }
 0x556   :  { %v556_v20 = vmul.f32 %v555_v18, %v548_v7  ;;  %v564_v21 = vmul.f32 %v1833_v58, %v563_v19 }
 0x558   :  { %v558_v22 = vsel %vm557_vm3, %v548_v7, %v556_v20  ;;  %v565_v23 = vmul.f32 0.5, %v564_v21 }
 0x559   :  { %v561_v24 = vsel %vm559_vm4, %v560_v57, %v558_v22 }
 0x55a   :  { %v574_v25 = vadd.f32 1e-06, %v561_v24  ;;  %v566_v26 = vsub.f32 1.5, %v565_v23 }
 0x55c   :  { %1834 = vrcp.f32 %v574_v25  ;;  %v567_v27 = vmul.f32 %v1833_v58, %v566_v26 }
 0x55e   :  { %v568_v28 = vmul.f32 %v567_v27, %v549_v13 }
 0x560   :  { %v570_v30 = vsel %vm569_vm5, %v549_v13, %v568_v28 }
 0x561   :  { %v573_v31 = vsel %vm571_vm14, %v572_v29, %v570_v30 }
 0x562   :  { %v1835_v33 = vpop.eup %1834  ;;  %v575_v34 = vadd.f32 1e-06, %v573_v31 }
 0x563   :  { %v578_v36 = vmul.f32 %v1835_v33, %v538_v61 }
 0x564   :  { %1836 = vrcp.f32 %v575_v34 }
 0x565   :  { %v581_v37 = vmul.f32 %v580_v32, %v578_v36 }
 0x567   :  { %v584_v11 = vadd.f32 %v583_v9, %v581_v37 }
 0x569   :  { %v587_v38 = vrot.slane %v584_v11, 5 }
 0x56a   :  { %v1837_v40 = vpop.eup %1836 }
 0x56b   :  { %v589_v41 = vsel %vm170_vm6, 0.0, %v587_v38  ;;  %v590_v42 = vsel %vm170_vm6, %v587_v38, 0.0  ;;  %v579_v44 = vmul.f32 %v1837_v40, %v539_v4 }
 0x56c   :  { %v621_v49 = vrot.slane %v589_v41, 6  ;;  %v622_v45 = vrot.slane %v590_v42, 6  ;;  %v615_v50 = vrot.slane %v589_v41, 5  ;;  %v616_v47 = vrot.slane %v590_v42, 5 }
 0x56d   :  { %v593_v43 = vrot.slane %v589_v41, 1  ;;  %v594_v0 = vrot.slane %v590_v42, 1  ;;  %v582_v54 = vmul.f32 %v580_v32, %v579_v44  ;;  %v605_v56 = vrot.slane %v589_v41, 3 }
 0x56e   :  { %v623_v52 = vsel %vm207_vm9, %v621_v49, %v622_v45  ;;  %v617_v46 = vsel %vm170_vm6, %v615_v50, %v616_v47  ;;  %v606_v59 = vrot.slane %v590_v42, 3  ;;  %v599_v60 = vrot.slane %v589_v41, 2 }
 0x56f   :  { %624 = vrot.lane.b32.xlu1 %v623_v52, %s1954_s28  ;;  %618 = vrot.lane.b32.xlu0 %v617_v46, %s1953_s27  ;;  %v595_v53 = vsel %vm175_vm8, %v593_v43, %v594_v0  ;;  %v585_v55 = vadd.f32 %v583_v9, %v582_v54  ;;  %v600_v39 = vrot.slane %v590_v42, 2  ;;  %v612_v20 = vrot.slane %v590_v42, 4 }
 0x570   :  { %596 = vrot.lane.b32.xlu2 %v595_v53, %s1953_s27  ;;  %v607_v1 = vsel %vm189_vm7, %v605_v56, %v606_v59  ;;  %v611_v21 = vrot.slane %v589_v41, 4 }
 0x571   :  { %v633_v61 = vrot.slane %v585_v55, 5  ;;  %v601_v3 = vsel %vm182_vm10, %v599_v60, %v600_v39 }
 0x572   :  { %v613_v23 = vsel %vm196_vm11, %v611_v21, %v612_v20 }
 0x573   :  { %v635_v62 = vsel %vm170_vm6, 0.0, %v633_v61  ;;  %v636_v63 = vsel %vm170_vm6, %v633_v61, 0.0 }
 0x574   :  { %v667_v4 = vrot.slane %v635_v62, 6  ;;  %v668_v48 = vrot.slane %v636_v63, 6  ;;  %v661_v6 = vrot.slane %v635_v62, 5  ;;  %v662_v7 = vrot.slane %v636_v63, 5 }
 0x575   :  { %v639_v8 = vrot.slane %v635_v62, 1  ;;  %v640_v12 = vrot.slane %v636_v63, 1  ;;  %v651_v13 = vrot.slane %v635_v62, 3  ;;  %v652_v14 = vrot.slane %v636_v63, 3 }
 0x576   :  { %v669_v5 = vsel %vm207_vm9, %v667_v4, %v668_v48  ;;  %v663_v15 = vsel %vm170_vm6, %v661_v6, %v662_v7  ;;  %v645_v58 = vrot.slane %v635_v62, 2  ;;  %v646_v18 = vrot.slane %v636_v63, 2 }
 0x577   :  { %608 = vrot.lane.b32.xlu1 %v607_v1, %s1952_s26  ;;  %602 = vrot.lane.b32.xlu0 %v601_v3, %s1954_s28  ;;  %v641_v16 = vsel %vm175_vm8, %v639_v8, %v640_v12  ;;  %v653_v17 = vsel %vm189_vm7, %v651_v13, %v652_v14  ;;  %v658_v32 = vrot.slane %v636_v63, 4  ;;  %v657_v33 = vrot.slane %v635_v62, 4 }
 0x578   :  { %670 = vrot.lane.b32.xlu2 %v669_v5, %s1954_s28  ;;  %v647_v19 = vsel %vm182_vm10, %v645_v58, %v646_v18 }
 0x579   :  { %v659_v9 = vsel %vm196_vm11, %v657_v33, %v658_v32 }
 0x57f   :  { %664 = vrot.lane.b32.xlu0 %v663_v15, %s1953_s27  ;;  %642 = vrot.lane.b32.xlu1 %v641_v16, %s1953_s27 }
 0x580   :  { %654 = vrot.lane.b32.xlu2 %v653_v17, %s1952_s26 }
 0x587   :  { %648 = vrot.lane.b32.xlu0 %v647_v19, %s1954_s28 }
 0x5ca   :  { %v597_v26 = vpop.permute.xlu2 %596 }
 0x5cb   :  { %v627_v27 = vsel %vm103_vm0, %v589_v41, %v597_v26  ;;  %v2466_v26 = vld [vmem:[%s2759_s4] sm:$0x3f]  ;;  %s1961_s4 = smov 56  }
 0x5d2   :  { %v671_v34 = vpop.permute.xlu2 %670 }
 0x5da   :  { %v655_v42 = vpop.permute.xlu2 %654 }
 0x5e1   :  { %v625_v57 = vpop.permute.xlu1 %624  ;;  %v619_v22 = vpop.permute.xlu0 %618 }
 0x5e2   :  { %v630_v24 = vsel %vm103_vm0, %v613_v23, %v619_v22 }
 0x5e3   :  { %v631_v25 = vsel %vm215_vm12, %v630_v24, %v625_v57 }
 0x5e4   :  { %1708 = vmatmul.msk.f32.vlgmr.msrb.gmra.mxu3 %vm217_vm13, %v631_v25 }
 0x5e9   :  { %v609_v28 = vpop.permute.xlu1 %608  ;;  %v603_v29 = vpop.permute.xlu0 %602 }
 0x5ea   :  { %v628_v30 = vsel %vm215_vm12, %v627_v27, %v603_v29  ;;  %v784_v27 = vperm.slane %v2466_v26, 3 }
 0x5eb   :  { %v629_v31 = vsel %vm217_vm13, %v628_v30, %v609_v28 }
 0x5ec   :  { %700 = vmatmul.f32.vlgmr.msrb.gmra.mxu1 %v629_v31  ;;  %v2472_v31 = vld [vmem:[%s2760_s5] sm:$0x3f]  ;;  %s1962_s5 = smov 40  }
 0x5ed   :  { %v787_v32 = vperm.slane %v2472_v31, 3 }
 0x5f1   :  { %v665_v36 = vpop.permute.xlu0 %664  ;;  %v643_v38 = vpop.permute.xlu1 %642 }
 0x5f2   :  { %v676_v37 = vsel %vm103_vm0, %v659_v9, %v665_v36  ;;  %v673_v40 = vsel %vm103_vm0, %v635_v62, %v643_v38 }
 0x5f3   :  { %v677_v11 = vsel %vm215_vm12, %v676_v37, %v671_v34 }
 0x5f4   :  { %1709 = vmatmul.msk.f32.gmra.mxu3 %vm217_vm13, %v677_v11 }
 0x5f9   :  { %v649_v41 = vpop.permute.xlu0 %648 }
 0x5fa   :  { %v674_v44 = vsel %vm215_vm12, %v673_v40, %v649_v41 }
 0x5fb   :  { %v675_v49 = vsel %vm217_vm13, %v674_v44, %v655_v42 }
 0x5fc   :  { %703 = vmatmul.f32.gmra.mxu1 %v675_v49 }
 0x667   :  { %v724_v47 = vpop.f32.mrf.mxu3 }
 0x669   :  { %v701_v45 = vpop.f32.mrf.mxu1 }
 0x66a   :  { %v702_v50 = vadd.f32 %v2291_v35, %v701_v45 }
 0x66c   :  { %v725_v43 = vadd.f32 %v724_v47, %v702_v50 }
 0x66e   :  { %v730_v0 = vmax.f32 %v725_v43, 0.0 }
 0x670   :  { %v2443_v52 = vadd.f32 %v730_v0, %v2385_v51 }
 0x672   :  { %v734_v46 = vsel %vm103_vm0, %v2443_v52, 0.0 }
 0x673   :  { %735 = vadd.xlane.f32.xlu1 %v734_v46 }
 0x677   :  { %v727_v55 = vpop.f32.mrf.mxu3 }
 0x679   :  { %v704_v53 = vpop.f32.mrf.mxu1 }
 0x67a   :  { %v705_v54 = vadd.f32 %v2291_v35, %v704_v53 }
 0x67c   :  { %v728_v56 = vadd.f32 %v727_v55, %v705_v54 }
 0x67e   :  { %v731_v59 = vmax.f32 %v728_v56, 0.0 }
 0x680   :  { %v2449_v60 = vadd.f32 %v731_v59, %v2391_v2 }
 0x682   :  { %v737_v39 = vsel %vm103_vm0, %v2449_v60, 0.0 }
 0x683   :  { %738 = vadd.xlane.f32.xlu0 %v737_v39 }
 0x6e6   :  { %v736_v61 = vpop.xlane.xlu1 %735 }
 0x6e7   :  { %v740_v51 = vmul.f32 %v736_v61, %v2060_v10 }
 0x6e9   :  { %v742_v62 = vsub.f32 %v2443_v52, %v740_v51 }
 0x6eb   :  { %v744_v63 = vmul.f32 %v742_v62, %v742_v62 }
 0x6ed   :  { %v746_v1 = vsel %vm103_vm0, %v744_v63, 0.0 }
 0x6ee   :  { %747 = vadd.xlane.f32.xlu2 %v746_v1 }
 0x6f6   :  { %v739_v3 = vpop.xlane.xlu0 %738 }
 0x6f7   :  { %v741_v4 = vmul.f32 %v739_v3, %v2060_v10 }
 0x6f9   :  { %v2458_v48 = vsub.f32 %v2449_v60, %v741_v4 }
 0x6fb   :  { %v745_v2 = vmul.f32 %v2458_v48, %v2458_v48 }
 0x6fd   :  { %v749_v5 = vsel %vm103_vm0, %v745_v2, 0.0 }
 0x6fe   :  { %750 = vadd.xlane.f32.xlu1 %v749_v5 }
 0x761   :  { %v748_v6 = vpop.xlane.xlu2 %747 }
 0x762   :  { %v752_v7 = vmul.f32 0.032258064, %v748_v6 }
 0x764   :  { %1838 = vrsqrt.f32 %v752_v7  ;;  %vm761_vm15 = vcmp.eq.f32.partialorder %v752_v7, inf  ;;  %v764_v19 = vand.u32 2147483648, %v752_v7  ;;  %vm763_vm1 = vcmp.eq.f32.partialorder %v752_v7, 0.0 }
 0x76a   :  { %v1839_v8 = vpop.eup %1838 }
 0x76b   :  { %v755_v12 = vmul.f32 %v1839_v8, %v752_v7 }
 0x76d   :  { %v756_v13 = vmul.f32 %v1839_v8, %v755_v12 }
 0x76f   :  { %v757_v14 = vmul.f32 0.5, %v756_v13 }
 0x771   :  { %v758_v15 = vsub.f32 1.5, %v757_v14  ;;  %v751_v16 = vpop.xlane.xlu1 %750 }
 0x772   :  { %v753_v17 = vmul.f32 0.032258064, %v751_v16 }
 0x773   :  { %v759_v58 = vmul.f32 %v1839_v8, %v758_v15 }
 0x774   :  { %1840 = vrsqrt.f32 %v753_v17  ;;  %vm773_vm2 = vcmp.eq.f32.partialorder %v753_v17, inf  ;;  %v776_v9 = vand.u32 2147483648, %v753_v17  ;;  %vm775_vm3 = vcmp.eq.f32.partialorder %v753_v17, 0.0 }
 0x775   :  { %v760_v18 = vmul.f32 %v759_v58, %v752_v7 }
 0x777   :  { %v762_v20 = vsel %vm761_vm15, %v752_v7, %v760_v18 }
 0x778   :  { %v765_v21 = vsel %vm763_vm1, %v764_v19, %v762_v20 }
 0x779   :  { %v778_v57 = vadd.f32 1e-06, %v765_v21 }
 0x77a   :  { %v1841_v22 = vpop.eup %1840 }
 0x77b   :  { %1842 = vrcp.f32 %v778_v57  ;;  %v767_v23 = vmul.f32 %v1841_v22, %v753_v17 }
 0x77d   :  { %v768_v24 = vmul.f32 %v1841_v22, %v767_v23 }
 0x77f   :  { %v769_v25 = vmul.f32 0.5, %v768_v24 }
 0x781   :  { %v1843_v28 = vpop.eup %1842  ;;  %v770_v29 = vsub.f32 1.5, %v769_v25 }
 0x782   :  { %v782_v30 = vmul.f32 %v1843_v28, %v742_v62 }
 0x783   :  { %v771_v33 = vmul.f32 %v1841_v22, %v770_v29 }
 0x784   :  { %v785_v34 = vmul.f32 %v784_v27, %v782_v30 }
 0x785   :  { %v772_v36 = vmul.f32 %v771_v33, %v753_v17 }
 0x786   :  { %v788_v37 = vadd.f32 %v787_v32, %v785_v34 }
 0x787   :  { %v774_v11 = vsel %vm773_vm2, %v753_v17, %v772_v36 }
 0x788   :  { %v777_v38 = vsel %vm775_vm3, %v776_v9, %v774_v11  ;;  %v791_v40 = vrot.slane %v788_v37, 5 }
 0x789   :  { %v779_v41 = vadd.f32 1e-06, %v777_v38 }
 0x78a   :  { %v793_v42 = vsel %vm170_vm6, 0.0, %v791_v40  ;;  %v794_v44 = vsel %vm170_vm6, %v791_v40, 0.0 }
 0x78b   :  { %1844 = vrcp.f32 %v779_v41  ;;  %v825_v49 = vrot.slane %v793_v42, 6  ;;  %v826_v45 = vrot.slane %v794_v44, 6  ;;  %v819_v50 = vrot.slane %v793_v42, 5 }
 0x78c   :  { %v820_v47 = vrot.slane %v794_v44, 5  ;;  %v797_v43 = vrot.slane %v793_v42, 1  ;;  %v798_v0 = vrot.slane %v794_v44, 1  ;;  %v809_v56 = vrot.slane %v793_v42, 3 }
 0x78d   :  { %v827_v46 = vsel %vm207_vm9, %v825_v49, %v826_v45  ;;  %v810_v59 = vrot.slane %v794_v44, 3  ;;  %v803_v39 = vrot.slane %v793_v42, 2  ;;  %v804_v61 = vrot.slane %v794_v44, 2 }
 0x78e   :  { %828 = vrot.lane.b32.xlu2 %v827_v46, %s1954_s28  ;;  %v821_v53 = vsel %vm170_vm6, %v819_v50, %v820_v47  ;;  %v799_v54 = vsel %vm175_vm8, %v797_v43, %v798_v0  ;;  %v816_v57 = vrot.slane %v794_v44, 4  ;;  %v815_v22 = vrot.slane %v793_v42, 4 }
 0x78f   :  { %822 = vrot.lane.b32.xlu0 %v821_v53, %s1953_s27  ;;  %800 = vrot.lane.b32.xlu1 %v799_v54, %s1953_s27  ;;  %v811_v63 = vsel %vm189_vm7, %v809_v56, %v810_v59  ;;  %v805_v1 = vsel %vm182_vm10, %v803_v39, %v804_v61 }
 0x790   :  { %v817_v25 = vsel %vm196_vm11, %v815_v22, %v816_v57 }
 0x791   :  { %v1845_v55 = vpop.eup %1844 }
 0x792   :  { %v783_v51 = vmul.f32 %v1845_v55, %v2458_v48 }
 0x794   :  { %v786_v62 = vmul.f32 %v784_v27, %v783_v51 }
 0x796   :  { %812 = vrot.lane.b32.xlu2 %v811_v63, %s1952_s26  ;;  %v789_v3 = vadd.f32 %v787_v32, %v786_v62 }
 0x797   :  { %806 = vrot.lane.b32.xlu0 %v805_v1, %s1954_s28 }
 0x798   :  { %v837_v4 = vrot.slane %v789_v3, 5 }
 0x79a   :  { %v839_v2 = vsel %vm170_vm6, 0.0, %v837_v4  ;;  %v840_v5 = vsel %vm170_vm6, %v837_v4, 0.0 }
 0x79b   :  { %v843_v6 = vrot.slane %v839_v2, 1  ;;  %v844_v7 = vrot.slane %v840_v5, 1  ;;  %v865_v8 = vrot.slane %v839_v2, 5  ;;  %v866_v12 = vrot.slane %v840_v5, 5 }
 0x79c   :  { %v871_v48 = vrot.slane %v839_v2, 6  ;;  %v872_v13 = vrot.slane %v840_v5, 6  ;;  %v849_v17 = vrot.slane %v839_v2, 2  ;;  %v850_v58 = vrot.slane %v840_v5, 2 }
 0x79d   :  { %v845_v14 = vsel %vm175_vm8, %v843_v6, %v844_v7  ;;  %v867_v15 = vsel %vm170_vm6, %v865_v8, %v866_v12  ;;  %v855_v18 = vrot.slane %v839_v2, 3  ;;  %v856_v19 = vrot.slane %v840_v5, 3 }
 0x79e   :  { %846 = vrot.lane.b32.xlu2 %v845_v14, %s1953_s27  ;;  %v873_v16 = vsel %vm207_vm9, %v871_v48, %v872_v13  ;;  %v851_v20 = vsel %vm182_vm10, %v849_v17, %v850_v58  ;;  %v861_v9 = vrot.slane %v839_v2, 4  ;;  %v862_v37 = vrot.slane %v840_v5, 4  ;;  %v997_v48 = vld [vmem:[%s2761_s6 + $0x18] sm:$0xff]  ;;  %v996_v13 = vld [vmem:[%s2761_s6 + $0x10] sm:$0xff]  ;;  %v995_v14 = vld [vmem:[%s2761_s6 + $0x8] sm:$0xff] }
 0x79f   :  { %868 = vrot.lane.b32.xlu0 %v867_v15, %s1953_s27  ;;  %874 = vrot.lane.b32.xlu1 %v873_v16, %s1954_s28  ;;  %v857_v21 = vsel %vm189_vm7, %v855_v18, %v856_v19  ;;  %v994_v16 = vld [vmem:[%s2761_s6] sm:$0xff]  ;;  %vm1037_vm10 = vcmask 64512  }
 0x7a0   :  { %v863_v11 = vsel %vm196_vm11, %v861_v9, %v862_v37  ;;  %1020 = vmatpush.msra.mxu3 %v997_v48  ;;  %vm1069_vm11 = vcmask 130048  }
 0x7a2   :  { %1021 = vmatpush.msra.mxu3 %v996_v13 }
 0x7a4   :  { %1022 = vmatpush.msra.mxu3 %v995_v14 }
 0x7a6   :  { %1023 = vmatpush.msra.mxu3 %v994_v16 }
 0x7a7   :  { %852 = vrot.lane.b32.xlu0 %v851_v20, %s1954_s28  ;;  %858 = vrot.lane.b32.xlu1 %v857_v21, %s1952_s26 }
 0x7e8   :  { %v829_v23 = vpop.permute.xlu2 %828 }
 0x7f0   :  { %v813_v33 = vpop.permute.xlu2 %812 }
 0x801   :  { %v823_v24 = vpop.permute.xlu0 %822  ;;  %v801_v29 = vpop.permute.xlu1 %800 }
 0x802   :  { %v834_v27 = vsel %vm103_vm0, %v817_v25, %v823_v24  ;;  %v831_v30 = vsel %vm103_vm0, %v793_v42, %v801_v29  ;;  %v847_v42 = vpop.permute.xlu2 %846 }
 0x803   :  { %v835_v28 = vsel %vm215_vm12, %v834_v27, %v829_v23  ;;  %v877_v49 = vsel %vm103_vm0, %v839_v2, %v847_v42 }
 0x804   :  { %1710 = vmatmul.msk.f32.vlgmr.msrb.gmra.mxu2 %vm217_vm13, %v835_v28 }
 0x809   :  { %v807_v32 = vpop.permute.xlu0 %806 }
 0x80a   :  { %v832_v34 = vsel %vm215_vm12, %v831_v30, %v807_v32 }
 0x80b   :  { %v833_v36 = vsel %vm217_vm13, %v832_v34, %v813_v33 }
 0x80c   :  { %904 = vmatmul.f32.vlgmr.msrb.gmra.mxu0 %v833_v36  ;;  %v988_v36 = vperm.slane %v2466_v26, 4 }
 0x811   :  { %v869_v38 = vpop.permute.xlu0 %868  ;;  %v875_v40 = vpop.permute.xlu1 %874 }
 0x812   :  { %v880_v41 = vsel %vm103_vm0, %v863_v11, %v869_v38  ;;  %v991_v38 = vperm.slane %v2472_v31, 4 }
 0x813   :  { %v881_v44 = vsel %vm215_vm12, %v880_v41, %v875_v40 }
 0x814   :  { %1711 = vmatmul.msk.f32.gmra.mxu2 %vm217_vm13, %v881_v44 }
 0x819   :  { %v853_v45 = vpop.permute.xlu0 %852  ;;  %v859_v50 = vpop.permute.xlu1 %858 }
 0x81a   :  { %v878_v47 = vsel %vm215_vm12, %v877_v49, %v853_v45 }
 0x81b   :  { %v879_v43 = vsel %vm217_vm13, %v878_v47, %v859_v50 }
 0x81c   :  { %907 = vmatmul.f32.gmra.mxu0 %v879_v43 }
 0x887   :  { %v928_v53 = vpop.f32.mrf.mxu2 }
 0x889   :  { %v905_v0 = vpop.f32.mrf.mxu0 }
 0x88a   :  { %v906_v46 = vadd.f32 %v2291_v35, %v905_v0 }
 0x88c   :  { %v929_v54 = vadd.f32 %v928_v53, %v906_v46 }
 0x88e   :  { %v934_v55 = vmax.f32 %v929_v54, 0.0  ;;  %v1808_v54 = vld [vmem:[%s2762_s7] ss:$0 sm:$0xff] }
 0x890   :  { %v2516_v56 = vadd.f32 %v934_v55, %v2443_v52 }
 0x892   :  { %v938_v59 = vsel %vm103_vm0, %v2516_v56, 0.0 }
 0x893   :  { %939 = vadd.xlane.f32.xlu2 %v938_v59 }
 0x897   :  { %v931_v51 = vpop.f32.mrf.mxu2 }
 0x899   :  { %v908_v39 = vpop.f32.mrf.mxu0 }
 0x89a   :  { %v909_v61 = vadd.f32 %v2291_v35, %v908_v39 }
 0x89c   :  { %v932_v62 = vadd.f32 %v931_v51, %v909_v61 }
 0x89e   :  { %v935_v63 = vmax.f32 %v932_v62, 0.0 }
 0x8a0   :  { %v2522_v1 = vadd.f32 %v935_v63, %v2449_v60  ;;  %v2568_v63 = vld [vmem:[%s2756_s1] sm:$0xff] }
 0x8a2   :  { %v941_v3 = vsel %vm103_vm0, %v2522_v1, 0.0 }
 0x8a3   :  { %942 = vadd.xlane.f32.xlu0 %v941_v3 }
 0x906   :  { %v940_v4 = vpop.xlane.xlu2 %939 }
 0x907   :  { %v944_v52 = vmul.f32 %v940_v4, %v2060_v10 }
 0x909   :  { %v946_v2 = vsub.f32 %v2516_v56, %v944_v52 }
 0x90b   :  { %v948_v5 = vmul.f32 %v946_v2, %v946_v2 }
 0x90d   :  { %v950_v6 = vsel %vm103_vm0, %v948_v5, 0.0 }
 0x90e   :  { %951 = vadd.xlane.f32.xlu1 %v950_v6 }
 0x916   :  { %v943_v35 = vpop.xlane.xlu0 %942 }
 0x917   :  { %v945_v7 = vmul.f32 %v943_v35, %v2060_v10 }
 0x919   :  { %v947_v8 = vsub.f32 %v2522_v1, %v945_v7 }
 0x91b   :  { %v949_v60 = vmul.f32 %v947_v8, %v947_v8 }
 0x91d   :  { %v953_v12 = vsel %vm103_vm0, %v949_v60, 0.0 }
 0x91e   :  { %954 = vadd.xlane.f32.xlu2 %v953_v12 }
 0x981   :  { %v952_v15 = vpop.xlane.xlu1 %951 }
 0x982   :  { %v956_v17 = vmul.f32 0.032258064, %v952_v15 }
 0x984   :  { %1846 = vrsqrt.f32 %v956_v17  ;;  %vm965_vm6 = vcmp.eq.f32.partialorder %v956_v17, inf  ;;  %v968_v25 = vand.u32 2147483648, %v956_v17  ;;  %vm967_vm7 = vcmp.eq.f32.partialorder %v956_v17, 0.0 }
 0x98a   :  { %v1847_v58 = vpop.eup %1846 }
 0x98b   :  { %v959_v18 = vmul.f32 %v1847_v58, %v956_v17 }
 0x98d   :  { %v960_v19 = vmul.f32 %v1847_v58, %v959_v18 }
 0x98f   :  { %v961_v20 = vmul.f32 0.5, %v960_v19 }
 0x991   :  { %v962_v21 = vsub.f32 1.5, %v961_v20  ;;  %v955_v57 = vpop.xlane.xlu2 %954 }
 0x992   :  { %v957_v22 = vmul.f32 0.032258064, %v955_v57 }
 0x993   :  { %v963_v23 = vmul.f32 %v1847_v58, %v962_v21 }
 0x994   :  { %1848 = vrsqrt.f32 %v957_v22  ;;  %vm977_vm8 = vcmp.eq.f32.partialorder %v957_v22, inf  ;;  %v980_v49 = vand.u32 2147483648, %v957_v22  ;;  %vm979_vm9 = vcmp.eq.f32.partialorder %v957_v22, 0.0 }
 0x995   :  { %v964_v24 = vmul.f32 %v963_v23, %v956_v17 }
 0x997   :  { %v966_v27 = vsel %vm965_vm6, %v956_v17, %v964_v24  ;;  %v99_v24 = vld [vmem:[%s2763_s8] sm:$0xff] }
 0x998   :  { %v969_v28 = vsel %vm967_vm7, %v968_v25, %v966_v27 }
 0x999   :  { %v982_v29 = vadd.f32 1e-06, %v969_v28 }
 0x99a   :  { %v1849_v30 = vpop.eup %1848 }
 0x99b   :  { %v971_v32 = vmul.f32 %v1849_v30, %v957_v22  ;;  %1850 = vrcp.f32 %v982_v29 }
 0x99d   :  { %v972_v33 = vmul.f32 %v1849_v30, %v971_v32 }
 0x99f   :  { %v973_v34 = vmul.f32 0.5, %v972_v33 }
 0x9a1   :  { %v1851_v9 = vpop.eup %1850  ;;  %v974_v37 = vsub.f32 1.5, %v973_v34 }
 0x9a2   :  { %v986_v11 = vmul.f32 %v1851_v9, %v946_v2  ;;  %v2575_v2 = vld [vmem:[%s2756_s1 + $0x8] sm:$0xff]  ;;  %s1956_s1 = smov 120  }
 0x9a3   :  { %v975_v40 = vmul.f32 %v1849_v30, %v974_v37 }
 0x9a4   :  { %v989_v41 = vmul.f32 %v988_v36, %v986_v11 }
 0x9a5   :  { %v976_v44 = vmul.f32 %v975_v40, %v957_v22 }
 0x9a6   :  { %v992_v42 = vadd.f32 %v991_v38, %v989_v41 }
 0x9a7   :  { %v978_v45 = vsel %vm977_vm8, %v957_v22, %v976_v44 }
 0x9a8   :  { %1712 = vmatmul.msk.f32.vlgmr.msra.gmra.mxu3 %vm103_vm0, %v992_v42  ;;  %v981_v50 = vsel %vm979_vm9, %v980_v49, %v978_v45 }
 0x9a9   :  { %v983_v47 = vadd.f32 1e-06, %v981_v50 }
 0x9ab   :  { %1852 = vrcp.f32 %v983_v47 }
 0x9b1   :  { %v1853_v43 = vpop.eup %1852 }
 0x9b2   :  { %v987_v0 = vmul.f32 %v1853_v43, %v947_v8 }
 0x9b4   :  { %v990_v46 = vmul.f32 %v988_v36, %v987_v0 }
 0x9b6   :  { %v993_v53 = vadd.f32 %v991_v38, %v990_v46 }
 0x9b8   :  { %1713 = vmatmul.msk.f32.gmra.mxu3 %vm103_vm0, %v993_v53 }
 0xa2b   :  { %v1025_v55 = vpop.f32.mrf.mxu3 }
 0xa2c   :  { %v2551_v59 = vadd.f32 %v1808_v54, %v1025_v55 }
 0xa2e   :  { %1033 = vrot.lane.b32.xlu1 %v2551_v59, %s1952_s26 }
 0xa3b   :  { %v1028_v39 = vpop.f32.mrf.mxu3 }
 0xa3c   :  { %v2555_v61 = vadd.f32 %v1808_v54, %v1028_v39 }
 0xa3e   :  { %1035 = vrot.lane.b32.xlu0 %v2555_v61, %s1952_s26  ;;  %v2581_v7 = vpack.i.bf16 %v2551_v59, %v2555_v61 }
 0xaa0   :  { %v1034_v62 = vpop.permute.xlu1 %1033 }
 0xab0   :  { %v1036_v51 = vpop.permute.xlu0 %1035 }
 0xab1   :  { %1714 = vmatpush.xpose.msk.msra.mxu1 %vm1037_vm10, %v1036_v51 }
 0xab5   :  { %1715 = vmatpush.xpose.msk.msra.mxu1 %vm1037_vm10, %v1034_v62 }
 0xab8   :  { %1716 = vmatmul.msk.f32.vlgmr.msra.gmra.mxu1 %vm1037_vm10, %v2551_v59 }
 0xac0   :  { %1717 = vmatmul.msk.f32.gmra.mxu1 %vm1037_vm10, %v2555_v61 }
 0xb35   :  { %v1063_v3 = vpop.f32.mrf.mxu1 }
 0xb36   :  { %v1064_v4 = vadd.f32 %v1063_v3, %v2568_v63 }
 0xb38   :  { %v1070_v52 = vsel %vm1069_vm11, %v1064_v4, -inf }
 0xb39   :  { %1071 = vmax.xlane.f32.xlu2 %v1070_v52 }
 0xb3d   :  { %v1066_v5 = vpop.f32.mrf.mxu1 }
 0xb3e   :  { %v1067_v6 = vadd.f32 %v1066_v5, %v2575_v2 }
 0xb40   :  { %v1073_v35 = vsel %vm1069_vm11, %v1067_v6, -inf }
 0xb41   :  { %1074 = vmax.xlane.f32.xlu2 %v1073_v35 }
 0xb59   :  { %1788 = vrot.lane.b32.xlu2 %v2581_v7, %s1954_s28  ;;  %s1960_s28 = smov 112  }
 0xb61   :  { %1133 = vrot.lane.b32.xlu2 %v2555_v61, %s1955_s29 }
 0xb69   :  { %1131 = vrot.lane.b32.xlu2 %v2551_v59, %s1955_s29  ;;  %s1691_s29 = sshll.u32 %s2769_s14, 4  ;;  %s1692_s29 = int_to_ptr.hbm [resolvable:$true] %s1691_s29 }
 0xb71   :  { %1127 = vrot.lane.b32.xlu2 %v2551_v59, %s1956_s1 }
 0xb79   :  { %1129 = vrot.lane.b32.xlu2 %v2555_v61, %s1956_s1 }
 0xb81   :  { %1412 = vrot.lane.b32.xlu2 %v2551_v59, %s1957_s30 }
 0xb89   :  { %1285 = vrot.lane.b32.xlu2 %v2551_v59, %s1958_s3 }
 0xb91   :  { %1410 = vrot.lane.b32.xlu2 %v2555_v61, %s1959_s15 }
 0xbac   :  { %v1072_v8 = vpop.xlane.xlu2 %1071 }
 0xbad   :  { %v1076_v60 = vsub.f32 %v1064_v4, %v1072_v8 }
 0xbaf   :  { %v1078_v12 = vmul.f32 1.442695, %v1076_v60 }
 0xbb1   :  { %1854 = vpow2.f32 %v1078_v12 }
 0xbb4   :  { %v1075_v48 = vpop.xlane.xlu2 %1074 }
 0xbb5   :  { %v1077_v13 = vsub.f32 %v1067_v6, %v1075_v48 }
 0xbb7   :  { %v1855_v14 = vpop.eup %1854  ;;  %v1080_v15 = vmul.f32 1.442695, %v1077_v13 }
 0xbb8   :  { %v1082_v16 = vsel %vm1069_vm11, %v1855_v14, 0.0 }
 0xbb9   :  { %1856 = vpow2.f32 %v1080_v15  ;;  %1083 = vadd.xlane.f32.xlu0 %v1082_v16 }
 0xbbc   :  { %v1789_v17 = vpop.permute.xlu2 %1788 }
 0xbbd   :  { %v1790_v58 = vunpack.i.l.bf16 %v1789_v17  ;;  %v1791_v19 = vunpack.i.h.bf16 %v1789_v17 }
 0xbbf   :  { %v1857_v18 = vpop.eup %1856  ;;  %1118 = vmatpush.msra.mxu2 %v1790_v58 }
 0xbc0   :  { %v1085_v20 = vsel %vm1069_vm11, %v1857_v18, 0.0 }
 0xbc1   :  { %1086 = vadd.xlane.f32.xlu1 %v1085_v20  ;;  %1119 = vmatpush.msra.mxu2 %v1791_v19 }
 0xbc3   :  { %1273 = vmatpush.msrb.mxu2 %v99_v24 }
 0xbc4   :  { %v1134_v21 = vpop.permute.xlu2 %1133 }
 0xbc5   :  { %1720 = vmatpush.xpose.msk.msra.mxu0 %vm1037_vm10, %v1134_v21 }
 0xbcc   :  { %v1132_v57 = vpop.permute.xlu2 %1131 }
 0xbcd   :  { %1414 = vrot.lane.b32.xlu0 %v2555_v61, %s1957_s30  ;;  %1721 = vmatpush.xpose.msk.msra.mxu0 %vm1037_vm10, %v1132_v57 }
 0xbd4   :  { %v1128_v22 = vpop.permute.xlu2 %1127 }
 0xbd5   :  { %1408 = vrot.lane.b32.xlu0 %v2551_v59, %s1959_s15  ;;  %1722 = vmatmul.msk.f32.vlgmr.msra.gmra.mxu0 %vm1037_vm10, %v1128_v22 }
 0xbda   :  { %1287 = vrot.lane.b32.xlu1 %v2555_v61, %s1958_s3 }
 0xbdc   :  { %v1130_v23 = vpop.permute.xlu2 %1129 }
 0xbdd   :  { %1281 = vrot.lane.b32.xlu0 %v2551_v59, %s1960_s28  ;;  %1723 = vmatmul.msk.f32.gmra.mxu0 %vm1037_vm10, %v1130_v23 }
 0xbe2   :  { %1283 = vrot.lane.b32.xlu1 %v2555_v61, %s1960_s28 }
 0xbe4   :  { %v1413_v34 = vpop.permute.xlu2 %1412 }
 0xbec   :  { %v1286_v37 = vpop.permute.xlu2 %1285 }
 0xbf4   :  { %v1411_v43 = vpop.permute.xlu2 %1410 }
 0xc2c   :  { %v1084_v25 = vpop.xlane.xlu0 %1083 }
 0xc2d   :  { %1858 = vrcp.f32 %v1084_v25 }
 0xc33   :  { %v1859_v27 = vpop.eup %1858 }
 0xc34   :  { %v1090_v28 = vmul.f32 %v1859_v27, %v1855_v14  ;;  %v1087_v29 = vpop.xlane.xlu1 %1086 }
 0xc35   :  { %1860 = vrcp.f32 %v1087_v29 }
 0xc36   :  { %1718 = vmatmul.msk.f32.vlgmr.msra.gmra.mxu2 %vm1069_vm11, %v1090_v28 }
 0xc3b   :  { %v1861_v30 = vpop.eup %1860 }
 0xc3c   :  { %v1091_v32 = vmul.f32 %v1861_v30, %v1857_v18 }
 0xc3e   :  { %1719 = vmatmul.msk.f32.gmra.mxu2 %vm1069_vm11, %v1091_v32 }
 0xc3f   :  { %v1415_v33 = vpop.permute.xlu0 %1414 }
 0xc40   :  { %1738 = vmatpush.xpose.msk.msra.mxu2 %vm1037_vm10, %v1415_v33 }
 0xc44   :  { %1739 = vmatpush.xpose.msk.msra.mxu2 %vm1037_vm10, %v1413_v34 }
 0xc47   :  { %v1409_v36 = vpop.permute.xlu0 %1408 }
 0xc4c   :  { %v1288_v9 = vpop.permute.xlu1 %1287 }
 0xc4d   :  { %1730 = vmatpush.xpose.msk.msrb.mxu0 %vm1037_vm10, %v1288_v9 }
 0xc4f   :  { %v1282_v38 = vpop.permute.xlu0 %1281 }
 0xc51   :  { %1731 = vmatpush.xpose.msk.msrb.mxu0 %vm1037_vm10, %v1286_v37 }
 0xc52   :  { %v1160_v11 = vpop.f32.mrf.mxu0 }
 0xc53   :  { %v1161_v40 = vadd.f32 %v1160_v11, %v2568_v63 }
 0xc54   :  { %1732 = vmatmul.msk.f32.vlgmr.msrb.gmra.mxu0 %vm1037_vm10, %v1282_v38  ;;  %v1284_v42 = vpop.permute.xlu1 %1283 }
 0xc55   :  { %v1166_v41 = vsel %vm1069_vm11, %v1161_v40, -inf }
 0xc56   :  { %1167 = vmax.xlane.f32.xlu0 %v1166_v41 }
 0xc5a   :  { %v1163_v44 = vpop.f32.mrf.mxu0 }
 0xc5b   :  { %v1164_v49 = vadd.f32 %v1163_v44, %v2575_v2 }
 0xc5c   :  { %1733 = vmatmul.msk.f32.gmra.mxu0 %vm1037_vm10, %v1284_v42 }
 0xc5d   :  { %v1169_v45 = vsel %vm1069_vm11, %v1164_v49, -inf }
 0xc5e   :  { %1170 = vmax.xlane.f32.xlu2 %v1169_v45 }
 0xcb9   :  { %v1121_v50 = vpop.f32.mrf.mxu2 }
 0xcba   :  { %1728 = vmatmul.msk.f32.vlgmr.msrb.gmra.mxu2 %vm1037_vm10, %v1121_v50 }
 0xcc1   :  { %v1124_v47 = vpop.f32.mrf.mxu2 }
 0xcc2   :  { %1729 = vmatmul.msk.f32.gmra.mxu2 %vm1037_vm10, %v1124_v47 }
 0xcc9   :  { %v1168_v61 = vpop.xlane.xlu0 %1167 }
 0xcca   :  { %1740 = vmatmul.msk.f32.vlgmr.msra.gmra.mxu2 %vm1037_vm10, %v1409_v36  ;;  %v1172_v62 = vsub.f32 %v1161_v40, %v1168_v61  ;;  %v100_v61 = vld [vmem:[%s2763_s8 + $0x8] sm:$0xff] }
 0xccb   :  { %1244 = vmatpush.msrb.mxu1 %v100_v61 }
 0xccc   :  { %v1174_v4 = vmul.f32 1.442695, %v1172_v62 }
 0xcce   :  { %1862 = vpow2.f32 %v1174_v4 }
 0xcd1   :  { %v1314_v0 = vpop.f32.mrf.mxu0  ;;  %v1171_v3 = vpop.xlane.xlu2 %1170 }
 0xcd2   :  { %v1315_v46 = vadd.f32 %v1314_v0, %v2568_v63  ;;  %1741 = vmatmul.msk.f32.gmra.mxu2 %vm1037_vm10, %v1411_v43  ;;  %v1173_v6 = vsub.f32 %v1164_v49, %v1171_v3 }
 0xcd4   :  { %v1320_v53 = vsel %vm1069_vm11, %v1315_v46, -inf  ;;  %v1176_v48 = vmul.f32 1.442695, %v1173_v6  ;;  %v1863_v14 = vpop.eup %1862 }
 0xcd5   :  { %1321 = vmax.xlane.f32.xlu1 %v1320_v53 }
 0xcd6   :  { %1864 = vpow2.f32 %v1176_v48 }
 0xcd9   :  { %v1317_v54 = vpop.f32.mrf.mxu0 }
 0xcda   :  { %v1318_v55 = vadd.f32 %v1317_v54, %v2575_v2 }
 0xcdc   :  { %v1323_v59 = vsel %vm1069_vm11, %v1318_v55, -inf  ;;  %v1865_v57 = vpop.eup %1864 }
 0xcdd   :  { %1324 = vmax.xlane.f32.xlu2 %v1323_v59 }
 0xcf5   :  { %1793 = vrot.lane.b32.xlu2 %v2581_v7, %s1961_s4 }
 0xcfd   :  { %1803 = vrot.lane.b32.xlu2 %v2581_v7, %s1962_s5 }
 0xd3d   :  { %v2630_v39 = vpop.f32.mrf.mxu2 }
 0xd45   :  { %v2632_v51 = vpop.f32.mrf.mxu2 }
 0xd48   :  { %v1322_v52 = vpop.xlane.xlu1 %1321 }
 0xd49   :  { %v1326_v8 = vsub.f32 %v1315_v46, %v1322_v52 }
 0xd4b   :  { %v1328_v13 = vmul.f32 1.442695, %v1326_v8 }
 0xd4d   :  { %v1441_v5 = vpop.f32.mrf.mxu2  ;;  %1866 = vpow2.f32 %v1328_v13 }
 0xd4e   :  { %v1442_v35 = vadd.f32 %v1441_v5, %v2568_v63  ;;  %v1178_v63 = vsel %vm1069_vm11, %v1863_v14, 0.0  ;;  %v101_v5 = vld [vmem:[%s2763_s8 + $0x10] sm:$0xff] }
 0xd4f   :  { %1398 = vmatpush.msra.mxu1 %v101_v5  ;;  %v1641_v5 = vld [vmem:[%s2767_s12 + $0x18] sm:$0xff] }
 0xd50   :  { %v1325_v60 = vpop.xlane.xlu2 %1324  ;;  %v1447_v12 = vsel %vm1069_vm11, %v1442_v35, -inf }
 0xd51   :  { %1448 = vmax.xlane.f32.xlu0 %v1447_v12  ;;  %v1327_v17 = vsub.f32 %v1318_v55, %v1325_v60  ;;  %v102_v60 = vld [vmem:[%s2763_s8 + $0x18] sm:$0xff] }
 0xd53   :  { %v1330_v20 = vmul.f32 1.442695, %v1327_v17  ;;  %v1867_v22 = vpop.eup %1866 }
 0xd54   :  { %v1332_v24 = vsel %vm1069_vm11, %v1867_v22, 0.0 }
 0xd55   :  { %v1444_v15 = vpop.f32.mrf.mxu2  ;;  %1868 = vpow2.f32 %v1330_v20 }
 0xd56   :  { %v1445_v16 = vadd.f32 %v1444_v15, %v2575_v2  ;;  %v1181_v2 = vsel %vm1069_vm11, %v1865_v57, 0.0 }
 0xd58   :  { %v1794_v58 = vpop.permute.xlu2 %1793  ;;  %v1450_v18 = vsel %vm1069_vm11, %v1445_v16, -inf }
 0xd59   :  { %v1795_v19 = vunpack.i.l.bf16 %v1794_v58  ;;  %1451 = vmax.xlane.f32.xlu1 %v1450_v18  ;;  %1179 = vadd.xlane.f32.xlu0 %v1178_v63  ;;  %v1796_v21 = vunpack.i.h.bf16 %v1794_v58 }
 0xd5b   :  { %1214 = vmatpush.msrb.mxu3 %v1795_v19  ;;  %v1869_v28 = vpop.eup %1868 }
 0xd5c   :  { %v1335_v29 = vsel %vm1069_vm11, %v1869_v28, 0.0 }
 0xd5d   :  { %1215 = vmatpush.msrb.mxu3 %v1796_v21  ;;  %v1809_v21 = vld [vmem:[%s2764_s9] ss:$0 sm:$0xff] }
 0xd60   :  { %v1804_v23 = vpop.permute.xlu2 %1803 }
 0xd61   :  { %v1805_v25 = vunpack.i.l.bf16 %v1804_v23  ;;  %1182 = vadd.xlane.f32.xlu1 %v1181_v2  ;;  %1333 = vadd.xlane.f32.xlu0 %v1332_v24  ;;  %v1806_v27 = vunpack.i.h.bf16 %v1804_v23 }
 0xd63   :  { %1495 = vmatpush.msra.mxu0 %v1805_v25 }
 0xd65   :  { %1496 = vmatpush.msra.mxu0 %v1806_v27 }
 0xd69   :  { %1336 = vadd.xlane.f32.xlu1 %v1335_v29 }
 0xd75   :  { %1798 = vrot.lane.b32.xlu0 %v2581_v7, %s1963_s20 }
 0xdc4   :  { %v1449_v30 = vpop.xlane.xlu0 %1448 }
 0xdc5   :  { %v1453_v32 = vsub.f32 %v1442_v35, %v1449_v30 }
 0xdc7   :  { %v1455_v33 = vmul.f32 1.442695, %v1453_v32 }
 0xdc9   :  { %1870 = vpow2.f32 %v1455_v33 }
 0xdcc   :  { %v1452_v34 = vpop.xlane.xlu1 %1451  ;;  %v1180_v36 = vpop.xlane.xlu0 %1179 }
 0xdcd   :  { %v1454_v9 = vsub.f32 %v1445_v16, %v1452_v34  ;;  %1872 = vrcp.f32 %v1180_v36 }
 0xdcf   :  { %v1871_v37 = vpop.eup %1870  ;;  %v1457_v11 = vmul.f32 1.442695, %v1454_v9 }
 0xdd0   :  { %v1459_v38 = vsel %vm1069_vm11, %v1871_v37, 0.0 }
 0xdd1   :  { %1874 = vpow2.f32 %v1457_v11  ;;  %1460 = vadd.xlane.f32.xlu1 %v1459_v38  ;;  %v1602_v38 = vld [vmem:[%s2765_s10 + $0x18] sm:$0xff] }
 0xdd3   :  { %v1873_v40 = vpop.eup %1872 }
 0xdd4   :  { %v1186_v41 = vmul.f32 %v1873_v40, %v1863_v14  ;;  %v1183_v44 = vpop.xlane.xlu1 %1182  ;;  %v1334_v50 = vpop.xlane.xlu0 %1333  ;;  %v1601_v40 = vld [vmem:[%s2765_s10 + $0x10] sm:$0xff] }
 0xdd5   :  { %1876 = vrcp.f32 %v1183_v44 }
 0xdd6   :  { %1724 = vmatmul.msk.f32.vlgmr.msrb.gmra.mxu3 %vm1069_vm11, %v1186_v41  ;;  %1878 = vrcp.f32 %v1334_v50  ;;  %v1599_v41 = vld [vmem:[%s2765_s10] sm:$0xff] }
 0xdd7   :  { %v1875_v7 = vpop.eup %1874 }
 0xdd8   :  { %v1462_v42 = vsel %vm1069_vm11, %v1875_v7, 0.0 }
 0xdd9   :  { %1463 = vadd.xlane.f32.xlu1 %v1462_v42 }
 0xddb   :  { %v1877_v49 = vpop.eup %1876 }
 0xddc   :  { %v1187_v45 = vmul.f32 %v1877_v49, %v1865_v57  ;;  %v1337_v47 = vpop.xlane.xlu1 %1336  ;;  %v1879_v0 = vpop.eup %1878 }
 0xddd   :  { %1880 = vrcp.f32 %v1337_v47  ;;  %v1340_v54 = vmul.f32 %v1879_v0, %v1867_v22  ;;  %v1645_v0 = vld [vmem:[%s2767_s12 + $0x38] sm:$0xff] }
 0xdde   :  { %1725 = vmatmul.msk.f32.gmra.mxu3 %vm1069_vm11, %v1187_v45  ;;  %1660 = vmatpush.msrb.mxu2 %v1645_v0 }
 0xde3   :  { %v1881_v55 = vpop.eup %1880 }
 0xde4   :  { %v1341_v59 = vmul.f32 %v1881_v55, %v1869_v28  ;;  %v1643_v55 = vld [vmem:[%s2767_s12 + $0x28] sm:$0xff] }
 0xde7   :  { %v1799_v43 = vpop.permute.xlu0 %1798 }
 0xde8   :  { %v1800_v46 = vunpack.i.l.bf16 %v1799_v43  ;;  %v1801_v53 = vunpack.i.h.bf16 %v1799_v43 }
 0xdea   :  { %1368 = vmatpush.msra.mxu3 %v1800_v46  ;;  %v1644_v46 = vld [vmem:[%s2767_s12 + $0x30] sm:$0xff] }
 0xdeb   :  { %1661 = vmatpush.msrb.mxu2 %v1644_v46 }
 0xdec   :  { %1369 = vmatpush.msra.mxu3 %v1801_v53 }
 0xded   :  { %1734 = vmatmul.msk.f32.vlgmr.msra.gmra.mxu3 %vm1069_vm11, %v1340_v54  ;;  %1662 = vmatpush.msrb.mxu2 %v1643_v55 }
 0xdee   :  { %1525 = vmatpush.msrb.mxu3 %v102_v60 }
 0xdf5   :  { %1735 = vmatmul.msk.f32.gmra.mxu3 %vm1069_vm11, %v1341_v59 }
 0xe44   :  { %v1461_v62 = vpop.xlane.xlu1 %1460 }
 0xe45   :  { %1882 = vrcp.f32 %v1461_v62  ;;  %v1642_v62 = vld [vmem:[%s2767_s12 + $0x20] sm:$0xff] }
 0xe46   :  { %1663 = vmatpush.msrb.mxu2 %v1642_v62 }
 0xe48   :  { %1664 = vmatpush.msrb.mxu2 %v1641_v5 }
 0xe4b   :  { %v1883_v3 = vpop.eup %1882 }
 0xe4c   :  { %v1467_v4 = vmul.f32 %v1883_v3, %v1871_v37  ;;  %v1464_v52 = vpop.xlane.xlu1 %1463 }
 0xe4d   :  { %1884 = vrcp.f32 %v1464_v52 }
 0xe4e   :  { %1742 = vmatmul.msk.f32.vlgmr.msra.gmra.mxu0 %vm1069_vm11, %v1467_v4 }
 0xe53   :  { %v1885_v6 = vpop.eup %1884 }
 0xe54   :  { %v1468_v35 = vmul.f32 %v1885_v6, %v1875_v7 }
 0xe56   :  { %1743 = vmatmul.msk.f32.gmra.mxu0 %vm1069_vm11, %v1468_v35 }
 0xe59   :  { %v1217_v8 = vpop.f32.mrf.mxu3 }
 0xe5a   :  { %1726 = vmatmul.msk.f32.vlgmr.msrb.gmra.mxu1 %vm1037_vm10, %v1217_v8 }
 0xe5b   :  { %1625 = vmatpush.msrb.mxu1 %v1602_v38 }
 0xe5d   :  { %1626 = vmatpush.msrb.mxu1 %v1601_v40 }
 0xe61   :  { %v1220_v12 = vpop.f32.mrf.mxu3 }
 0xe62   :  { %1727 = vmatmul.msk.f32.gmra.mxu1 %vm1037_vm10, %v1220_v12 }
 0xe70   :  { %v1371_v48 = vpop.f32.mrf.mxu3 }
 0xe71   :  { %1736 = vmatmul.msk.f32.vlgmr.msra.gmra.mxu1 %vm1037_vm10, %v1371_v48 }
 0xe78   :  { %v1374_v13 = vpop.f32.mrf.mxu3 }
 0xe79   :  { %1737 = vmatmul.msk.f32.gmra.mxu1 %vm1037_vm10, %v1374_v13 }
 0xecb   :  { %v1498_v14 = vpop.f32.mrf.mxu0 }
 0xecc   :  { %1744 = vmatmul.msk.f32.vlgmr.msrb.gmra.mxu3 %vm1037_vm10, %v1498_v14 }
 0xed3   :  { %v1501_v15 = vpop.f32.mrf.mxu0 }
 0xed4   :  { %1745 = vmatmul.msk.f32.gmra.mxu3 %vm1037_vm10, %v1501_v15 }
 0xed7   :  { %v1246_v16 = vpop.f32.mrf.mxu1 }
 0xed8   :  { %v1276_v18 = vadd.f32 %v2630_v39, %v1246_v16  ;;  %v1593_v16 = vperm.slane %v2466_v26, 5  ;;  %v1640_v26 = vld [vmem:[%s2767_s12 + $0x10] sm:$0xff] }
 0xed9   :  { %1665 = vmatpush.msrb.mxu2 %v1640_v26 }
 0xedf   :  { %v1249_v17 = vpop.f32.mrf.mxu1 }
 0xee0   :  { %v1279_v23 = vadd.f32 %v2632_v51, %v1249_v17 }
 0xeee   :  { %v1400_v58 = vpop.f32.mrf.mxu1 }
 0xeef   :  { %v1406_v63 = vadd.f32 %v1400_v58, %v1276_v18 }
 0xef6   :  { %v1403_v22 = vpop.f32.mrf.mxu1 }
 0xef7   :  { %v1407_v24 = vadd.f32 %v1403_v22, %v1279_v23 }
 0xf4f   :  { %v1527_v19 = vpop.f32.mrf.mxu3 }
 0xf50   :  { %v1533_v20 = vadd.f32 %v1527_v19, %v1406_v63  ;;  %v1596_v19 = vperm.slane %v2472_v31, 5  ;;  %v1639_v31 = vld [vmem:[%s2767_s12 + $0x8] sm:$0xff] }
 0xf51   :  { %1666 = vmatpush.msrb.mxu2 %v1639_v31 }
 0xf52   :  { %v1535_v57 = vadd.f32 %v1533_v20, %v2516_v56 }
 0xf54   :  { %v2672_v2 = vadd.f32 %v1809_v21, %v1535_v57 }
 0xf56   :  { %v1543_v25 = vsel %vm103_vm0, %v2672_v2, 0.0 }
 0xf57   :  { %1544 = vadd.xlane.f32.xlu2 %v1543_v25  ;;  %v1530_v39 = vpop.f32.mrf.mxu3  ;;  %v1638_v25 = vld [vmem:[%s2767_s12] sm:$0xff] }
 0xf58   :  { %v1534_v27 = vadd.f32 %v1530_v39, %v1407_v24  ;;  %1667 = vmatpush.msrb.mxu2 %v1638_v25  ;;  %v1810_v39 = vld [vmem:[%s2766_s11] ss:$0 sm:$0xff]  ;;  %s1964_s11 = smov [#allocation5]  }
 0xf59   :  { %s1689_s12 = sshll.u32 %s1964_s11, 4  ;;  %s1690_s12 = int_to_ptr.vmem [resolvable:$true] %s1689_s12 }
 0xf5a   :  { %v1536_v28 = vadd.f32 %v1534_v27, %v2522_v1 }
 0xf5c   :  { %v2677_v29 = vadd.f32 %v1809_v21, %v1536_v28 }
 0xf5e   :  { %v1546_v30 = vsel %vm103_vm0, %v2677_v29, 0.0 }
 0xf5f   :  { %1547 = vadd.xlane.f32.xlu0 %v1546_v30 }
 0xfca   :  { %v1545_v56 = vpop.xlane.xlu2 %1544 }
 0xfcb   :  { %v1549_v51 = vmul.f32 %v1545_v56, %v2060_v10 }
 0xfcd   :  { %v2683_v32 = vsub.f32 %v2672_v2, %v1549_v51 }
 0xfcf   :  { %v1553_v33 = vmul.f32 %v2683_v32, %v2683_v32 }
 0xfd1   :  { %v1555_v34 = vsel %vm103_vm0, %v1553_v33, 0.0  ;;  %v1811_v33 = vld [vmem:[%s2768_s13] ss:$0 sm:$0xff] }
 0xfd2   :  { %1556 = vadd.xlane.f32.xlu1 %v1555_v34  ;;  %v1548_v36 = vpop.xlane.xlu0 %1547 }
 0xfd3   :  { %v1550_v1 = vmul.f32 %v1548_v36, %v2060_v10  ;;  %v1600_v10 = vld [vmem:[%s2765_s10 + $0x8] sm:$0xff] }
 0xfd4   :  { %1627 = vmatpush.msrb.mxu1 %v1600_v10 }
 0xfd5   :  { %v2690_v9 = vsub.f32 %v2677_v29, %v1550_v1 }
 0xfd6   :  { %1628 = vmatpush.msrb.mxu1 %v1599_v41 }
 0xfd7   :  { %v1554_v37 = vmul.f32 %v2690_v9, %v2690_v9 }
 0xfd9   :  { %v1558_v11 = vsel %vm103_vm0, %v1554_v37, 0.0 }
 0xfda   :  { %1559 = vadd.xlane.f32.xlu1 %v1558_v11 }
0x1045   :  { %v1557_v44 = vpop.xlane.xlu1 %1556 }
0x1046   :  { %v1561_v7 = vmul.f32 0.032258064, %v1557_v44 }
0x1048   :  { %1886 = vrsqrt.f32 %v1561_v7  ;;  %vm1570_vm13 = vcmp.eq.f32.partialorder %v1561_v7, inf  ;;  %v1573_v52 = vand.u32 2147483648, %v1561_v7  ;;  %vm1572_vm4 = vcmp.eq.f32.partialorder %v1561_v7, 0.0 }
0x104d   :  { %v1560_v42 = vpop.xlane.xlu1 %1559 }
0x104e   :  { %v1887_v49 = vpop.eup %1886  ;;  %v1562_v45 = vmul.f32 0.032258064, %v1560_v42 }
0x104f   :  { %v1564_v50 = vmul.f32 %v1887_v49, %v1561_v7 }
0x1050   :  { %1888 = vrsqrt.f32 %v1562_v45  ;;  %vm1582_vm5 = vcmp.eq.f32.partialorder %v1562_v45, inf  ;;  %v1585_v14 = vand.u32 2147483648, %v1562_v45  ;;  %vm1584_vm14 = vcmp.eq.f32.partialorder %v1562_v45, 0.0 }
0x1051   :  { %v1565_v47 = vmul.f32 %v1887_v49, %v1564_v50 }
0x1053   :  { %v1566_v43 = vmul.f32 0.5, %v1565_v47 }
0x1055   :  { %v1567_v53 = vsub.f32 1.5, %v1566_v43 }
0x1056   :  { %v1889_v54 = vpop.eup %1888 }
0x1057   :  { %v1568_v59 = vmul.f32 %v1887_v49, %v1567_v53  ;;  %v1576_v61 = vmul.f32 %v1889_v54, %v1562_v45 }
0x1059   :  { %v1569_v3 = vmul.f32 %v1568_v59, %v1561_v7  ;;  %v1577_v4 = vmul.f32 %v1889_v54, %v1576_v61 }
0x105b   :  { %v1571_v6 = vsel %vm1570_vm13, %v1561_v7, %v1569_v3  ;;  %v1578_v35 = vmul.f32 0.5, %v1577_v4 }
0x105c   :  { %v1574_v8 = vsel %vm1572_vm4, %v1573_v52, %v1571_v6 }
0x105d   :  { %v1587_v60 = vadd.f32 1e-06, %v1574_v8  ;;  %v1579_v12 = vsub.f32 1.5, %v1578_v35 }
0x105f   :  { %1890 = vrcp.f32 %v1587_v60  ;;  %v1580_v48 = vmul.f32 %v1889_v54, %v1579_v12 }
0x1061   :  { %v1581_v13 = vmul.f32 %v1580_v48, %v1562_v45 }
0x1063   :  { %v1583_v15 = vsel %vm1582_vm5, %v1562_v45, %v1581_v13 }
0x1064   :  { %v1586_v17 = vsel %vm1584_vm14, %v1585_v14, %v1583_v15 }
0x1065   :  { %v1891_v58 = vpop.eup %1890  ;;  %v1588_v18 = vadd.f32 1e-06, %v1586_v17 }
0x1066   :  { %v1591_v63 = vmul.f32 %v1891_v58, %v2683_v32 }
0x1067   :  { %1892 = vrcp.f32 %v1588_v18 }
0x1068   :  { %v1594_v20 = vmul.f32 %v1593_v16, %v1591_v63 }
0x106a   :  { %v1597_v21 = vadd.f32 %v1596_v19, %v1594_v20 }
0x106c   :  { %1746 = vmatmul.msk.f32.vlgmr.msrb.gmra.mxu1 %vm103_vm0, %v1597_v21 }
0x106d   :  { %v1893_v57 = vpop.eup %1892 }
0x106e   :  { %v1592_v22 = vmul.f32 %v1893_v57, %v2690_v9 }
0x1070   :  { %v1595_v23 = vmul.f32 %v1593_v16, %v1592_v22 }
0x1072   :  { %v1598_v24 = vadd.f32 %v1596_v19, %v1595_v23 }
0x1074   :  { %1747 = vmatmul.msk.f32.gmra.mxu1 %vm103_vm0, %v1598_v24 }
0x10e9   :  { %v1630_v27 = vpop.f32.mrf.mxu1 }
0x10ea   :  { %v1631_v28 = vadd.f32 %v1810_v39, %v1630_v27 }
0x10ec   :  { %v1636_v30 = vmax.f32 %v1631_v28, 0.0 }
0x10ee   :  { %1748 = vmatmul.msk.f32.vlgmr.msrb.gmra.mxu2 %vm215_vm12, %v1636_v30 }
0x10f1   :  { %v1633_v56 = vpop.f32.mrf.mxu1 }
0x10f2   :  { %v1634_v51 = vadd.f32 %v1810_v39, %v1633_v56 }
0x10f4   :  { %v1637_v32 = vmax.f32 %v1634_v51, 0.0 }
0x10f6   :  { %1749 = vmatmul.msk.f32.gmra.mxu2 %vm215_vm12, %v1637_v32 }
0x1171   :  { %v1669_v34 = vpop.f32.mrf.mxu2 }
0x1172   :  { %v1675_v36 = vadd.f32 %v1669_v34, %v2672_v2 }
0x1174   :  { %v1681_v1 = vadd.f32 %v1811_v33, %v1675_v36 }
0x1176   :  { %1683 = vst.msk [vmem:[#allocation5] sm:$0xff] %vm103_vm0, %v1681_v1 }
0x1179   :  { %v1672_v9 = vpop.f32.mrf.mxu2 }
0x117a   :  { %v1676_v37 = vadd.f32 %v1672_v9, %v2677_v29 }
0x117c   :  { %v1682_v11 = vadd.f32 %v1811_v33, %v1676_v37 }
0x117e   :  { %1684 = vst.msk [vmem:[#allocation5 + $0x8] sm:$0xff] %vm103_vm0, %v1682_v11 }
0x117f   :  { %1697 = dma.vmem_to_hbm [thread:$0]  %s1690_s12, 256, %s1692_s29, [#allocation4], %s1949_s18, %s1949_s18, %s1950_s19  }
0x1180   :  { %1946 = dma.done.wait [#allocation4], 256  }
0x1181   :  { %1947 = vsyncadd [#allocation4], 4294967040 }
0x1182   :  { %1702 = vsyncpa [#allocation3], 1 }
0x1183   :  { %1703 = vsyncpa [#allocation4], 1 }

</bundles_post_ra>
